<compile_context>
chip_gen: v7x
topology: tpu7x:2x2x1
jax: 0.10.0
libtpu: 0.0.40
codegen_flags: <defaults>
</compile_context>

<pallas_src>
import functools

import jax
import jax.numpy as jnp
from jax import lax
from jax.experimental import pallas as pl
from jax.experimental.pallas import tpu as pltpu

# ---- scaled-down DeiT config (structure of deit-base-distilled-patch16-224) ----
IMG = 32            # image size (224 in the real model)
PATCH = 16          # patch size (same as real model)
CHANNELS = 3
HIDDEN = 32         # hidden_size (768 in the real model)
NUM_HEADS = 2       # (12 in the real model)
HEAD_DIM = HIDDEN // NUM_HEADS
INTERMEDIATE = 64   # (3072 in the real model)
NUM_LAYERS = 2      # (12 in the real model)
NUM_PATCHES = (IMG // PATCH) ** 2
SEQ = NUM_PATCHES + 2           # [CLS] + [DIST] + patches
EPS = 1e-12                     # DeiT layer_norm_eps
SCALE = 1.0 / (HEAD_DIM ** 0.5)


# ----------------------------- in-kernel helpers -----------------------------
def _layernorm(x, g, b):
    mu = jnp.mean(x, axis=-1, keepdims=True)
    var = jnp.mean(jnp.square(x - mu), axis=-1, keepdims=True)
    return (x - mu) * lax.rsqrt(var + EPS) * g + b


def _gelu(x):
    # TODO(synk): HF DeiT uses exact erf-GELU; tanh-approx GELU used since exp/tanh have
    # guaranteed EUP lowerings in Mosaic while erf does not.
    return 0.5 * x * (1.0 + jnp.tanh(0.7978845608028654 * (x + 0.044715 * x * x * x)))


# ------------------------------ fused Pallas kernel ---------------------------
def fused_deit_kernel(patches_ref, pw_ref, pb_ref, tokpos_ref,
                      ln1g_ref, ln1b_ref, wqkv_ref, bqkv_ref, wo_ref, bo_ref,
                      ln2g_ref, ln2b_ref, w1_ref, b1_ref, w2_ref, b2_ref,
                      fg_ref, fb_ref,
                      o_ref, h_scr, ctx_scr, *, batch):
    H, HD, S, NP = HIDDEN, HEAD_DIM, SEQ, NUM_PATCHES

    # ---- patch embedding: (B*NP, C*P*P) @ (C*P*P, H) + b ----
    pe = (jnp.dot(patches_ref[...], pw_ref[...], preferred_element_type=jnp.float32)
          + pb_ref[...])

    # ---- assemble [CLS][DIST][patches] + position embeddings into VMEM scratch ----
    tok = tokpos_ref[...]                       # (S, H): cls+pos0, dist+pos1, pos2..
    for b in range(batch):
        h_scr[b * S:b * S + 2, :] = tok[0:2, :]
        h_scr[b * S + 2:(b + 1) * S, :] = pe[b * NP:(b + 1) * NP, :] + tok[2:, :]

    # ---- transformer encoder (static layer loop, all weights VMEM-resident) ----
    for l in range(NUM_LAYERS):
        x = h_scr[...]                          # (B*S, H): batch folded into M

        # self-attention (pre-LN), fused QKV projection
        xn = _layernorm(x, ln1g_ref[l], ln1b_ref[l])
        qkv = (jnp.dot(xn, wqkv_ref[l], preferred_element_type=jnp.float32)
               + bqkv_ref[l])                   # (B*S, 3H)

        for b in range(batch):
            r0, r1 = b * S, (b + 1) * S
            for hh in range(NUM_HEADS):
                c0 = hh * HD
                qh = qkv[r0:r1, c0:c0 + HD]
                kh = qkv[r0:r1, H + c0:H + c0 + HD]
                vh = qkv[r0:r1, 2 * H + c0:2 * H + c0 + HD]
                s = lax.dot_general(qh, kh, (((1,), (1,)), ((), ())),
                                    preferred_element_type=jnp.float32) * SCALE
                s = s - jnp.max(s, axis=-1, keepdims=True)
                p = jnp.exp(s)
                p = p / jnp.sum(p, axis=-1, keepdims=True)
                ctx_scr[r0:r1, c0:c0 + HD] = jnp.dot(
                    p, vh, preferred_element_type=jnp.float32)

        # single output projection over the whole batch (contexts live in ctx_scr)
        attn = (jnp.dot(ctx_scr[...], wo_ref[l], preferred_element_type=jnp.float32)
                + bo_ref[l])
        h1 = x + attn

        # MLP (pre-LN)
        h1n = _layernorm(h1, ln2g_ref[l], ln2b_ref[l])
        inter = _gelu(jnp.dot(h1n, w1_ref[l], preferred_element_type=jnp.float32)
                      + b1_ref[l])
        mlp = jnp.dot(inter, w2_ref[l], preferred_element_type=jnp.float32) + b2_ref[l]
        h_scr[...] = h1 + mlp

    # ---- final LayerNorm on the CLS row of each batch element only ----
    fg, fb = fg_ref[...], fb_ref[...]
    for b in range(batch):
        cls = h_scr[b * S:b * S + 1, :]
        o_ref[b:b + 1, :] = _layernorm(cls, fg, fb).astype(o_ref.dtype)


# ------------------------------ kernel wrapper --------------------------------
def _full_spec(shape):
    nd = len(shape)
    return pl.BlockSpec(shape, lambda i, _nd=nd: (0,) * _nd)


def feature_extractor_deit(x, params):
    """Equivalent of Feature_Extractor_Diet.forward: DeiT last_hidden_state[:, 0, :]."""
    B = x.shape[0]
    patches = patchify(x, PATCH).reshape(B * NUM_PATCHES, CHANNELS * PATCH * PATCH)

    # per-sequence-position additive term (batch-independent glue, computed once):
    # row0 = cls + pos0, row1 = dist + pos1, rows 2.. = pos
    tokpos = params["pos_emb"][0] + jnp.concatenate(
        [params["cls_token"][0], params["dist_token"][0],
         jnp.zeros((NUM_PATCHES, HIDDEN), jnp.float32)], axis=0)

    layers = params["layers"]

    def stk(name):
        return jnp.stack([lp[name] for lp in layers], axis=0)

    wqkv = jnp.stack([jnp.concatenate([lp["wq"], lp["wk"], lp["wv"]], axis=1)
                      for lp in layers], axis=0)                 # (L, H, 3H)
    bqkv = jnp.stack([jnp.concatenate([lp["bq"], lp["bk"], lp["bv"]], axis=1)
                      for lp in layers], axis=0)                 # (L, 1, 3H)

    args = (patches, params["patch_w"], params["patch_b"], tokpos,
            stk("ln1_g"), stk("ln1_b"), wqkv, bqkv, stk("wo"), stk("bo"),
            stk("ln2_g"), stk("ln2_b"), stk("w1"), stk("b1"), stk("w2"), stk("b2"),
            params["final_ln_g"], params["final_ln_b"])

    return pl.pallas_call(
        functools.partial(fused_deit_kernel, batch=B),
        grid=(1,),
        in_specs=[_full_spec(a.shape) for a in args],
        out_specs=pl.BlockSpec((B, HIDDEN), lambda i: (0, 0)),
        out_shape=jax.ShapeDtypeStruct((B, HIDDEN), jnp.float32),
        scratch_shapes=[pltpu.VMEM((B * SEQ, HIDDEN), jnp.float32),   # hidden state
                        pltpu.VMEM((B * SEQ, HIDDEN), jnp.float32)],  # attn context
    )(*args)


# --------------------------------- JAX glue -----------------------------------
def patchify(x, p):
    # NCHW -> (B, num_patches, C*P*P), patch pixels ordered (c, ph, pw)
    B, C, Hh, Ww = x.shape
    nh, nw = Hh // p, Ww // p
    x = x.reshape(B, C, nh, p, nw, p)
    x = x.transpose(0, 2, 4, 1, 3, 5)            # (B, nh, nw, C, P, P)
    return x.reshape(B, nh * nw, C * p * p)


def init_params(key):
    ks = iter(jax.random.split(key, 128))
    std = 0.02

    def nrm(shape):
        return std * jax.random.normal(next(ks), shape, jnp.float32)

    params = {
        "patch_w": nrm((CHANNELS * PATCH * PATCH, HIDDEN)),
        "patch_b": jnp.zeros((1, HIDDEN), jnp.float32),
        "cls_token": nrm((1, 1, HIDDEN)),
        "dist_token": nrm((1, 1, HIDDEN)),
        "pos_emb": nrm((1, SEQ, HIDDEN)),
        "final_ln_g": jnp.ones((1, HIDDEN), jnp.float32),
        "final_ln_b": jnp.zeros((1, HIDDEN), jnp.float32),
        "layers": [],
    }
    for _ in range(NUM_LAYERS):
        params["layers"].append({
            "ln1_g": jnp.ones((1, HIDDEN), jnp.float32),
            "ln1_b": jnp.zeros((1, HIDDEN), jnp.float32),
            "wq": nrm((HIDDEN, HIDDEN)), "bq": jnp.zeros((1, HIDDEN), jnp.float32),
            "wk": nrm((HIDDEN, HIDDEN)), "bk": jnp.zeros((1, HIDDEN), jnp.float32),
            "wv": nrm((HIDDEN, HIDDEN)), "bv": jnp.zeros((1, HIDDEN), jnp.float32),
            "wo": nrm((HIDDEN, HIDDEN)), "bo": jnp.zeros((1, HIDDEN), jnp.float32),
            "ln2_g": jnp.ones((1, HIDDEN), jnp.float32),
            "ln2_b": jnp.zeros((1, HIDDEN), jnp.float32),
            "w1": nrm((HIDDEN, INTERMEDIATE)),
            "b1": jnp.zeros((1, INTERMEDIATE), jnp.float32),
            "w2": nrm((INTERMEDIATE, HIDDEN)),
            "b2": jnp.zeros((1, HIDDEN), jnp.float32),
        })
    return params


if __name__ == "__main__":
    key = jax.random.PRNGKey(0)
    pkey, xkey = jax.random.split(key)
    params = init_params(pkey)
    x = jax.random.normal(xkey, (2, CHANNELS, IMG, IMG), jnp.float32)  # NCHW like PyTorch
    out = feature_extractor_deit(x, params)
    jax.block_until_ready(out)
    assert out.shape == (2, HIDDEN), out.shape
    assert bool(jnp.all(jnp.isfinite(out)))
    print("KERNEL_OK")
</pallas_src>

<mosaic_0001>
module attributes {stable_mosaic.version = 11 : i64} {
  func.func @fused_deit_kernel(%arg0: i32, %arg1: memref<8x768xf32, #tpu.memory_space<vmem>>, %arg2: memref<768x32xf32, #tpu.memory_space<vmem>>, %arg3: memref<1x32xf32, #tpu.memory_space<vmem>>, %arg4: memref<6x32xf32, #tpu.memory_space<vmem>>, %arg5: memref<2x1x32xf32, #tpu.memory_space<vmem>>, %arg6: memref<2x1x32xf32, #tpu.memory_space<vmem>>, %arg7: memref<2x32x96xf32, #tpu.memory_space<vmem>>, %arg8: memref<2x1x96xf32, #tpu.memory_space<vmem>>, %arg9: memref<2x32x32xf32, #tpu.memory_space<vmem>>, %arg10: memref<2x1x32xf32, #tpu.memory_space<vmem>>, %arg11: memref<2x1x32xf32, #tpu.memory_space<vmem>>, %arg12: memref<2x1x32xf32, #tpu.memory_space<vmem>>, %arg13: memref<2x32x64xf32, #tpu.memory_space<vmem>>, %arg14: memref<2x1x64xf32, #tpu.memory_space<vmem>>, %arg15: memref<2x64x32xf32, #tpu.memory_space<vmem>>, %arg16: memref<2x1x32xf32, #tpu.memory_space<vmem>>, %arg17: memref<1x32xf32, #tpu.memory_space<vmem>>, %arg18: memref<1x32xf32, #tpu.memory_space<vmem>>, %arg19: memref<2x32xf32, #tpu.memory_space<vmem>>, %arg20: memref<12x32xf32, #tpu.memory_space<vmem>>, %arg21: memref<12x32xf32, #tpu.memory_space<vmem>>) attributes {dimension_semantics = [#tpu.dimension_semantics<arbitrary>], iteration_bounds = array<i64: 1>, scalar_prefetch = 0 : i64, scratch_operands = 2 : i64, tpu.core_type = #tpu.core_type<tc>, window_params = [{pipeline_mode = #tpu.pipeline_mode<synchronous>, transform_indices = @transform_0, window_bounds = array<i64: 8, 768>}, {pipeline_mode = #tpu.pipeline_mode<synchronous>, transform_indices = @transform_1, window_bounds = array<i64: 768, 32>}, {pipeline_mode = #tpu.pipeline_mode<synchronous>, transform_indices = @transform_2, window_bounds = array<i64: 1, 32>}, {pipeline_mode = #tpu.pipeline_mode<synchronous>, transform_indices = @transform_3, window_bounds = array<i64: 6, 32>}, {pipeline_mode = #tpu.pipeline_mode<synchronous>, transform_indices = @transform_4, window_bounds = array<i64: 2, 1, 32>}, {pipeline_mode = #tpu.pipeline_mode<synchronous>, transform_indices = @transform_5, window_bounds = array<i64: 2, 1, 32>}, {pipeline_mode = #tpu.pipeline_mode<synchronous>, transform_indices = @transform_6, window_bounds = array<i64: 2, 32, 96>}, {pipeline_mode = #tpu.pipeline_mode<synchronous>, transform_indices = @transform_7, window_bounds = array<i64: 2, 1, 96>}, {pipeline_mode = #tpu.pipeline_mode<synchronous>, transform_indices = @transform_8, window_bounds = array<i64: 2, 32, 32>}, {pipeline_mode = #tpu.pipeline_mode<synchronous>, transform_indices = @transform_9, window_bounds = array<i64: 2, 1, 32>}, {pipeline_mode = #tpu.pipeline_mode<synchronous>, transform_indices = @transform_10, window_bounds = array<i64: 2, 1, 32>}, {pipeline_mode = #tpu.pipeline_mode<synchronous>, transform_indices = @transform_11, window_bounds = array<i64: 2, 1, 32>}, {pipeline_mode = #tpu.pipeline_mode<synchronous>, transform_indices = @transform_12, window_bounds = array<i64: 2, 32, 64>}, {pipeline_mode = #tpu.pipeline_mode<synchronous>, transform_indices = @transform_13, window_bounds = array<i64: 2, 1, 64>}, {pipeline_mode = #tpu.pipeline_mode<synchronous>, transform_indices = @transform_14, window_bounds = array<i64: 2, 64, 32>}, {pipeline_mode = #tpu.pipeline_mode<synchronous>, transform_indices = @transform_15, window_bounds = array<i64: 2, 1, 32>}, {pipeline_mode = #tpu.pipeline_mode<synchronous>, transform_indices = @transform_16, window_bounds = array<i64: 1, 32>}, {pipeline_mode = #tpu.pipeline_mode<synchronous>, transform_indices = @transform_17, window_bounds = array<i64: 1, 32>}, {pipeline_mode = #tpu.pipeline_mode<synchronous>, transform_indices = @transform_18, window_bounds = array<i64: 2, 32>}]} {
    %c0 = arith.constant 0 : index
    %c0_0 = arith.constant 0 : index
    %0 = vector.load %arg1[%c0, %c0_0] : memref<8x768xf32, #tpu.memory_space<vmem>>, vector<8x768xf32>
    %c0_1 = arith.constant 0 : index
    %c0_2 = arith.constant 0 : index
    %1 = vector.load %arg2[%c0_1, %c0_2] : memref<768x32xf32, #tpu.memory_space<vmem>>, vector<768x32xf32>
    %cst = arith.constant dense<0.000000e+00> : vector<8x32xf32>
    %2 = tpu.matmul %0, %1, %cst {dimension_numbers = #tpu.dot_dimension_numbers<[1], [0], [0], [1], [0, 0, 1, 1], [], []>} : vector<8x768xf32>, vector<768x32xf32>, vector<8x32xf32> -> vector<8x32xf32>
    %c0_3 = arith.constant 0 : index
    %c0_4 = arith.constant 0 : index
    %3 = vector.load %arg3[%c0_3, %c0_4] : memref<1x32xf32, #tpu.memory_space<vmem>>, vector<1x32xf32>
    %4 = vector.broadcast %3 : vector<1x32xf32> to vector<8x32xf32>
    %5 = arith.addf %2, %4 : vector<8x32xf32>
    %c0_5 = arith.constant 0 : index
    %c0_6 = arith.constant 0 : index
    %6 = vector.load %arg4[%c0_5, %c0_6] : memref<6x32xf32, #tpu.memory_space<vmem>>, vector<6x32xf32>
    %7 = vector.extract_strided_slice %6 {offsets = [0, 0], sizes = [2, 32], strides = [1, 1]} : vector<6x32xf32> to vector<2x32xf32>
    %c0_7 = arith.constant 0 : index
    %c0_8 = arith.constant 0 : index
    %8 = vector.load %arg20[%c0_7, %c0_8] : memref<12x32xf32, #tpu.memory_space<vmem>>, vector<2x32xf32>
    tpu.vector_store %arg20[%c0_7, %c0_8], %7 {strides = array<i32>} : memref<12x32xf32, #tpu.memory_space<vmem>>, vector<2x32xf32>,
    %9 = vector.extract_strided_slice %5 {offsets = [0, 0], sizes = [4, 32], strides = [1, 1]} : vector<8x32xf32> to vector<4x32xf32>
    %10 = vector.extract_strided_slice %6 {offsets = [2, 0], sizes = [4, 32], strides = [1, 1]} : vector<6x32xf32> to vector<4x32xf32>
    %11 = arith.addf %9, %10 : vector<4x32xf32>
    %c2 = arith.constant 2 : index
    %c0_9 = arith.constant 0 : index
    %12 = vector.load %arg20[%c2, %c0_9] : memref<12x32xf32, #tpu.memory_space<vmem>>, vector<4x32xf32>
    tpu.vector_store %arg20[%c2, %c0_9], %11 {strides = array<i32>} : memref<12x32xf32, #tpu.memory_space<vmem>>, vector<4x32xf32>,
    %13 = vector.extract_strided_slice %6 {offsets = [0, 0], sizes = [2, 32], strides = [1, 1]} : vector<6x32xf32> to vector<2x32xf32>
    %c6 = arith.constant 6 : index
    %c0_10 = arith.constant 0 : index
    %14 = vector.load %arg20[%c6, %c0_10] : memref<12x32xf32, #tpu.memory_space<vmem>>, vector<2x32xf32>
    tpu.vector_store %arg20[%c6, %c0_10], %13 {strides = array<i32>} : memref<12x32xf32, #tpu.memory_space<vmem>>, vector<2x32xf32>,
    %15 = vector.extract_strided_slice %5 {offsets = [4, 0], sizes = [4, 32], strides = [1, 1]} : vector<8x32xf32> to vector<4x32xf32>
    %16 = vector.extract_strided_slice %6 {offsets = [2, 0], sizes = [4, 32], strides = [1, 1]} : vector<6x32xf32> to vector<4x32xf32>
    %17 = arith.addf %15, %16 : vector<4x32xf32>
    %c8 = arith.constant 8 : index
    %c0_11 = arith.constant 0 : index
    %18 = vector.load %arg20[%c8, %c0_11] : memref<12x32xf32, #tpu.memory_space<vmem>>, vector<4x32xf32>
    tpu.vector_store %arg20[%c8, %c0_11], %17 {strides = array<i32>} : memref<12x32xf32, #tpu.memory_space<vmem>>, vector<4x32xf32>,
    %c0_12 = arith.constant 0 : index
    %c0_13 = arith.constant 0 : index
    %19 = vector.load %arg20[%c0_12, %c0_13] : memref<12x32xf32, #tpu.memory_space<vmem>>, vector<12x32xf32>
    %c0_14 = arith.constant 0 : index
    %c0_15 = arith.constant 0 : index
    %c0_16 = arith.constant 0 : index
    %20 = vector.load %arg5[%c0_14, %c0_15, %c0_16] : memref<2x1x32xf32, #tpu.memory_space<vmem>>, vector<1x1x32xf32>
    %21 = vector.shape_cast %20 : vector<1x1x32xf32> to vector<1x32xf32>
    %c0_17 = arith.constant 0 : index
    %c0_18 = arith.constant 0 : index
    %c0_19 = arith.constant 0 : index
    %22 = vector.load %arg6[%c0_17, %c0_18, %c0_19] : memref<2x1x32xf32, #tpu.memory_space<vmem>>, vector<1x1x32xf32>
    %23 = vector.shape_cast %22 : vector<1x1x32xf32> to vector<1x32xf32>
    %cst_20 = arith.constant dense<0.000000e+00> : vector<12xf32>
    %24 = vector.multi_reduction <add>, %19, %cst_20 [1] : vector<12x32xf32> to vector<12xf32>
    %25 = vector.shape_cast %24 : vector<12xf32> to vector<12x1xf32>
    %cst_21 = arith.constant 3.200000e+01 : f32
    %26 = vector.broadcast %cst_21 : f32 to vector<12x1xf32>
    %27 = arith.divf %25, %26 : vector<12x1xf32>
    %28 = vector.broadcast %27 : vector<12x1xf32> to vector<12x32xf32>
    %29 = arith.subf %19, %28 : vector<12x32xf32>
    %30 = arith.mulf %29, %29 : vector<12x32xf32>
    %cst_22 = arith.constant dense<0.000000e+00> : vector<12xf32>
    %31 = vector.multi_reduction <add>, %30, %cst_22 [1] : vector<12x32xf32> to vector<12xf32>
    %32 = vector.shape_cast %31 : vector<12xf32> to vector<12x1xf32>
    %cst_23 = arith.constant 3.200000e+01 : f32
    %33 = vector.broadcast %cst_23 : f32 to vector<12x1xf32>
    %34 = arith.divf %32, %33 : vector<12x1xf32>
    %35 = vector.broadcast %27 : vector<12x1xf32> to vector<12x32xf32>
    %36 = arith.subf %19, %35 : vector<12x32xf32>
    %cst_24 = arith.constant 9.99999996E-13 : f32
    %37 = vector.broadcast %cst_24 : f32 to vector<12x1xf32>
    %38 = arith.addf %34, %37 : vector<12x1xf32>
    %39 = math.rsqrt %38 : vector<12x1xf32>
    %40 = vector.broadcast %39 : vector<12x1xf32> to vector<12x32xf32>
    %41 = arith.mulf %36, %40 : vector<12x32xf32>
    %42 = vector.broadcast %21 : vector<1x32xf32> to vector<12x32xf32>
    %43 = arith.mulf %41, %42 : vector<12x32xf32>
    %44 = vector.broadcast %23 : vector<1x32xf32> to vector<12x32xf32>
    %45 = arith.addf %43, %44 : vector<12x32xf32>
    %c0_25 = arith.constant 0 : index
    %c0_26 = arith.constant 0 : index
    %c0_27 = arith.constant 0 : index
    %46 = vector.load %arg7[%c0_25, %c0_26, %c0_27] : memref<2x32x96xf32, #tpu.memory_space<vmem>>, vector<1x32x96xf32>
    %47 = vector.shape_cast %46 : vector<1x32x96xf32> to vector<32x96xf32>
    %cst_28 = arith.constant dense<0.000000e+00> : vector<12x96xf32>
    %48 = tpu.matmul %45, %47, %cst_28 {dimension_numbers = #tpu.dot_dimension_numbers<[1], [0], [0], [1], [0, 0, 1, 1], [], []>} : vector<12x32xf32>, vector<32x96xf32>, vector<12x96xf32> -> vector<12x96xf32>
    %c0_29 = arith.constant 0 : index
    %c0_30 = arith.constant 0 : index
    %c0_31 = arith.constant 0 : index
    %49 = vector.load %arg8[%c0_29, %c0_30, %c0_31] : memref<2x1x96xf32, #tpu.memory_space<vmem>>, vector<1x1x96xf32>
    %50 = vector.shape_cast %49 : vector<1x1x96xf32> to vector<1x96xf32>
    %51 = vector.broadcast %50 : vector<1x96xf32> to vector<12x96xf32>
    %52 = arith.addf %48, %51 : vector<12x96xf32>
    %53 = vector.extract_strided_slice %52 {offsets = [0, 0], sizes = [6, 16], strides = [1, 1]} : vector<12x96xf32> to vector<6x16xf32>
    %54 = vector.extract_strided_slice %52 {offsets = [0, 32], sizes = [6, 16], strides = [1, 1]} : vector<12x96xf32> to vector<6x16xf32>
    %55 = vector.extract_strided_slice %52 {offsets = [0, 64], sizes = [6, 16], strides = [1, 1]} : vector<12x96xf32> to vector<6x16xf32>
    %cst_32 = arith.constant dense<0.000000e+00> : vector<6x6xf32>
    %56 = tpu.matmul %53, %54, %cst_32 {dimension_numbers = #tpu.dot_dimension_numbers<[1], [1], [0], [0], [0, 0, 1, 0], [], []>} : vector<6x16xf32>, vector<6x16xf32>, vector<6x6xf32> -> vector<6x6xf32>
    %cst_33 = arith.constant 2.500000e-01 : f32
    %57 = vector.broadcast %cst_33 : f32 to vector<6x6xf32>
    %58 = arith.mulf %56, %57 : vector<6x6xf32>
    %cst_34 = arith.constant dense<0xFF800000> : vector<6xf32>
    %59 = vector.multi_reduction <maximumf>, %58, %cst_34 [1] : vector<6x6xf32> to vector<6xf32>
    %60 = vector.shape_cast %59 : vector<6xf32> to vector<6x1xf32>
    %61 = vector.broadcast %60 : vector<6x1xf32> to vector<6x6xf32>
    %62 = arith.subf %58, %61 : vector<6x6xf32>
    %63 = math.exp %62 : vector<6x6xf32>
    %cst_35 = arith.constant dense<0.000000e+00> : vector<6xf32>
    %64 = vector.multi_reduction <add>, %63, %cst_35 [1] : vector<6x6xf32> to vector<6xf32>
    %65 = vector.shape_cast %64 : vector<6xf32> to vector<6x1xf32>
    %66 = vector.broadcast %65 : vector<6x1xf32> to vector<6x6xf32>
    %67 = arith.divf %63, %66 : vector<6x6xf32>
    %cst_36 = arith.constant dense<0.000000e+00> : vector<6x16xf32>
    %68 = tpu.matmul %67, %55, %cst_36 {dimension_numbers = #tpu.dot_dimension_numbers<[1], [0], [0], [1], [0, 0, 1, 1], [], []>} : vector<6x6xf32>, vector<6x16xf32>, vector<6x16xf32> -> vector<6x16xf32>
    %c0_37 = arith.constant 0 : index
    %c0_38 = arith.constant 0 : index
    %69 = vector.load %arg21[%c0_37, %c0_38] : memref<12x32xf32, #tpu.memory_space<vmem>>, vector<6x16xf32>
    tpu.vector_store %arg21[%c0_37, %c0_38], %68 {strides = array<i32>} : memref<12x32xf32, #tpu.memory_space<vmem>>, vector<6x16xf32>,
    %70 = vector.extract_strided_slice %52 {offsets = [0, 16], sizes = [6, 16], strides = [1, 1]} : vector<12x96xf32> to vector<6x16xf32>
    %71 = vector.extract_strided_slice %52 {offsets = [0, 48], sizes = [6, 16], strides = [1, 1]} : vector<12x96xf32> to vector<6x16xf32>
    %72 = vector.extract_strided_slice %52 {offsets = [0, 80], sizes = [6, 16], strides = [1, 1]} : vector<12x96xf32> to vector<6x16xf32>
    %cst_39 = arith.constant dense<0.000000e+00> : vector<6x6xf32>
    %73 = tpu.matmul %70, %71, %cst_39 {dimension_numbers = #tpu.dot_dimension_numbers<[1], [1], [0], [0], [0, 0, 1, 0], [], []>} : vector<6x16xf32>, vector<6x16xf32>, vector<6x6xf32> -> vector<6x6xf32>
    %cst_40 = arith.constant 2.500000e-01 : f32
    %74 = vector.broadcast %cst_40 : f32 to vector<6x6xf32>
    %75 = arith.mulf %73, %74 : vector<6x6xf32>
    %cst_41 = arith.constant dense<0xFF800000> : vector<6xf32>
    %76 = vector.multi_reduction <maximumf>, %75, %cst_41 [1] : vector<6x6xf32> to vector<6xf32>
    %77 = vector.shape_cast %76 : vector<6xf32> to vector<6x1xf32>
    %78 = vector.broadcast %77 : vector<6x1xf32> to vector<6x6xf32>
    %79 = arith.subf %75, %78 : vector<6x6xf32>
    %80 = math.exp %79 : vector<6x6xf32>
    %cst_42 = arith.constant dense<0.000000e+00> : vector<6xf32>
    %81 = vector.multi_reduction <add>, %80, %cst_42 [1] : vector<6x6xf32> to vector<6xf32>
    %82 = vector.shape_cast %81 : vector<6xf32> to vector<6x1xf32>
    %83 = vector.broadcast %82 : vector<6x1xf32> to vector<6x6xf32>
    %84 = arith.divf %80, %83 : vector<6x6xf32>
    %cst_43 = arith.constant dense<0.000000e+00> : vector<6x16xf32>
    %85 = tpu.matmul %84, %72, %cst_43 {dimension_numbers = #tpu.dot_dimension_numbers<[1], [0], [0], [1], [0, 0, 1, 1], [], []>} : vector<6x6xf32>, vector<6x16xf32>, vector<6x16xf32> -> vector<6x16xf32>
    %c0_44 = arith.constant 0 : index
    %c16 = arith.constant 16 : index
    %86 = vector.load %arg21[%c0_44, %c16] : memref<12x32xf32, #tpu.memory_space<vmem>>, vector<6x16xf32>
    tpu.vector_store %arg21[%c0_44, %c16], %85 {strides = array<i32>} : memref<12x32xf32, #tpu.memory_space<vmem>>, vector<6x16xf32>,
    %87 = vector.extract_strided_slice %52 {offsets = [6, 0], sizes = [6, 16], strides = [1, 1]} : vector<12x96xf32> to vector<6x16xf32>
    %88 = vector.extract_strided_slice %52 {offsets = [6, 32], sizes = [6, 16], strides = [1, 1]} : vector<12x96xf32> to vector<6x16xf32>
    %89 = vector.extract_strided_slice %52 {offsets = [6, 64], sizes = [6, 16], strides = [1, 1]} : vector<12x96xf32> to vector<6x16xf32>
    %cst_45 = arith.constant dense<0.000000e+00> : vector<6x6xf32>
    %90 = tpu.matmul %87, %88, %cst_45 {dimension_numbers = #tpu.dot_dimension_numbers<[1], [1], [0], [0], [0, 0, 1, 0], [], []>} : vector<6x16xf32>, vector<6x16xf32>, vector<6x6xf32> -> vector<6x6xf32>
    %cst_46 = arith.constant 2.500000e-01 : f32
    %91 = vector.broadcast %cst_46 : f32 to vector<6x6xf32>
    %92 = arith.mulf %90, %91 : vector<6x6xf32>
    %cst_47 = arith.constant dense<0xFF800000> : vector<6xf32>
    %93 = vector.multi_reduction <maximumf>, %92, %cst_47 [1] : vector<6x6xf32> to vector<6xf32>
    %94 = vector.shape_cast %93 : vector<6xf32> to vector<6x1xf32>
    %95 = vector.broadcast %94 : vector<6x1xf32> to vector<6x6xf32>
    %96 = arith.subf %92, %95 : vector<6x6xf32>
    %97 = math.exp %96 : vector<6x6xf32>
    %cst_48 = arith.constant dense<0.000000e+00> : vector<6xf32>
    %98 = vector.multi_reduction <add>, %97, %cst_48 [1] : vector<6x6xf32> to vector<6xf32>
    %99 = vector.shape_cast %98 : vector<6xf32> to vector<6x1xf32>
    %100 = vector.broadcast %99 : vector<6x1xf32> to vector<6x6xf32>
    %101 = arith.divf %97, %100 : vector<6x6xf32>
    %cst_49 = arith.constant dense<0.000000e+00> : vector<6x16xf32>
    %102 = tpu.matmul %101, %89, %cst_49 {dimension_numbers = #tpu.dot_dimension_numbers<[1], [0], [0], [1], [0, 0, 1, 1], [], []>} : vector<6x6xf32>, vector<6x16xf32>, vector<6x16xf32> -> vector<6x16xf32>
    %c6_50 = arith.constant 6 : index
    %c0_51 = arith.constant 0 : index
    %103 = vector.load %arg21[%c6_50, %c0_51] : memref<12x32xf32, #tpu.memory_space<vmem>>, vector<6x16xf32>
    tpu.vector_store %arg21[%c6_50, %c0_51], %102 {strides = array<i32>} : memref<12x32xf32, #tpu.memory_space<vmem>>, vector<6x16xf32>,
    %104 = vector.extract_strided_slice %52 {offsets = [6, 16], sizes = [6, 16], strides = [1, 1]} : vector<12x96xf32> to vector<6x16xf32>
    %105 = vector.extract_strided_slice %52 {offsets = [6, 48], sizes = [6, 16], strides = [1, 1]} : vector<12x96xf32> to vector<6x16xf32>
    %106 = vector.extract_strided_slice %52 {offsets = [6, 80], sizes = [6, 16], strides = [1, 1]} : vector<12x96xf32> to vector<6x16xf32>
    %cst_52 = arith.constant dense<0.000000e+00> : vector<6x6xf32>
    %107 = tpu.matmul %104, %105, %cst_52 {dimension_numbers = #tpu.dot_dimension_numbers<[1], [1], [0], [0], [0, 0, 1, 0], [], []>} : vector<6x16xf32>, vector<6x16xf32>, vector<6x6xf32> -> vector<6x6xf32>
    %cst_53 = arith.constant 2.500000e-01 : f32
    %108 = vector.broadcast %cst_53 : f32 to vector<6x6xf32>
    %109 = arith.mulf %107, %108 : vector<6x6xf32>
    %cst_54 = arith.constant dense<0xFF800000> : vector<6xf32>
    %110 = vector.multi_reduction <maximumf>, %109, %cst_54 [1] : vector<6x6xf32> to vector<6xf32>
    %111 = vector.shape_cast %110 : vector<6xf32> to vector<6x1xf32>
    %112 = vector.broadcast %111 : vector<6x1xf32> to vector<6x6xf32>
    %113 = arith.subf %109, %112 : vector<6x6xf32>
    %114 = math.exp %113 : vector<6x6xf32>
    %cst_55 = arith.constant dense<0.000000e+00> : vector<6xf32>
    %115 = vector.multi_reduction <add>, %114, %cst_55 [1] : vector<6x6xf32> to vector<6xf32>
    %116 = vector.shape_cast %115 : vector<6xf32> to vector<6x1xf32>
    %117 = vector.broadcast %116 : vector<6x1xf32> to vector<6x6xf32>
    %118 = arith.divf %114, %117 : vector<6x6xf32>
    %cst_56 = arith.constant dense<0.000000e+00> : vector<6x16xf32>
    %119 = tpu.matmul %118, %106, %cst_56 {dimension_numbers = #tpu.dot_dimension_numbers<[1], [0], [0], [1], [0, 0, 1, 1], [], []>} : vector<6x6xf32>, vector<6x16xf32>, vector<6x16xf32> -> vector<6x16xf32>
    %c6_57 = arith.constant 6 : index
    %c16_58 = arith.constant 16 : index
    %120 = vector.load %arg21[%c6_57, %c16_58] : memref<12x32xf32, #tpu.memory_space<vmem>>, vector<6x16xf32>
    tpu.vector_store %arg21[%c6_57, %c16_58], %119 {strides = array<i32>} : memref<12x32xf32, #tpu.memory_space<vmem>>, vector<6x16xf32>,
    %c0_59 = arith.constant 0 : index
    %c0_60 = arith.constant 0 : index
    %121 = vector.load %arg21[%c0_59, %c0_60] : memref<12x32xf32, #tpu.memory_space<vmem>>, vector<12x32xf32>
    %c0_61 = arith.constant 0 : index
    %c0_62 = arith.constant 0 : index
    %c0_63 = arith.constant 0 : index
    %122 = vector.load %arg9[%c0_61, %c0_62, %c0_63] : memref<2x32x32xf32, #tpu.memory_space<vmem>>, vector<1x32x32xf32>
    %123 = vector.shape_cast %122 : vector<1x32x32xf32> to vector<32x32xf32>
    %cst_64 = arith.constant dense<0.000000e+00> : vector<12x32xf32>
    %124 = tpu.matmul %121, %123, %cst_64 {dimension_numbers = #tpu.dot_dimension_numbers<[1], [0], [0], [1], [0, 0, 1, 1], [], []>} : vector<12x32xf32>, vector<32x32xf32>, vector<12x32xf32> -> vector<12x32xf32>
    %c0_65 = arith.constant 0 : index
    %c0_66 = arith.constant 0 : index
    %c0_67 = arith.constant 0 : index
    %125 = vector.load %arg10[%c0_65, %c0_66, %c0_67] : memref<2x1x32xf32, #tpu.memory_space<vmem>>, vector<1x1x32xf32>
    %126 = vector.shape_cast %125 : vector<1x1x32xf32> to vector<1x32xf32>
    %127 = vector.broadcast %126 : vector<1x32xf32> to vector<12x32xf32>
    %128 = arith.addf %124, %127 : vector<12x32xf32>
    %129 = arith.addf %19, %128 : vector<12x32xf32>
    %c0_68 = arith.constant 0 : index
    %c0_69 = arith.constant 0 : index
    %c0_70 = arith.constant 0 : index
    %130 = vector.load %arg11[%c0_68, %c0_69, %c0_70] : memref<2x1x32xf32, #tpu.memory_space<vmem>>, vector<1x1x32xf32>
    %131 = vector.shape_cast %130 : vector<1x1x32xf32> to vector<1x32xf32>
    %c0_71 = arith.constant 0 : index
    %c0_72 = arith.constant 0 : index
    %c0_73 = arith.constant 0 : index
    %132 = vector.load %arg12[%c0_71, %c0_72, %c0_73] : memref<2x1x32xf32, #tpu.memory_space<vmem>>, vector<1x1x32xf32>
    %133 = vector.shape_cast %132 : vector<1x1x32xf32> to vector<1x32xf32>
    %cst_74 = arith.constant dense<0.000000e+00> : vector<12xf32>
    %134 = vector.multi_reduction <add>, %129, %cst_74 [1] : vector<12x32xf32> to vector<12xf32>
    %135 = vector.shape_cast %134 : vector<12xf32> to vector<12x1xf32>
    %cst_75 = arith.constant 3.200000e+01 : f32
    %136 = vector.broadcast %cst_75 : f32 to vector<12x1xf32>
    %137 = arith.divf %135, %136 : vector<12x1xf32>
    %138 = vector.broadcast %137 : vector<12x1xf32> to vector<12x32xf32>
    %139 = arith.subf %129, %138 : vector<12x32xf32>
    %140 = arith.mulf %139, %139 : vector<12x32xf32>
    %cst_76 = arith.constant dense<0.000000e+00> : vector<12xf32>
    %141 = vector.multi_reduction <add>, %140, %cst_76 [1] : vector<12x32xf32> to vector<12xf32>
    %142 = vector.shape_cast %141 : vector<12xf32> to vector<12x1xf32>
    %cst_77 = arith.constant 3.200000e+01 : f32
    %143 = vector.broadcast %cst_77 : f32 to vector<12x1xf32>
    %144 = arith.divf %142, %143 : vector<12x1xf32>
    %145 = vector.broadcast %137 : vector<12x1xf32> to vector<12x32xf32>
    %146 = arith.subf %129, %145 : vector<12x32xf32>
    %cst_78 = arith.constant 9.99999996E-13 : f32
    %147 = vector.broadcast %cst_78 : f32 to vector<12x1xf32>
    %148 = arith.addf %144, %147 : vector<12x1xf32>
    %149 = math.rsqrt %148 : vector<12x1xf32>
    %150 = vector.broadcast %149 : vector<12x1xf32> to vector<12x32xf32>
    %151 = arith.mulf %146, %150 : vector<12x32xf32>
    %152 = vector.broadcast %131 : vector<1x32xf32> to vector<12x32xf32>
    %153 = arith.mulf %151, %152 : vector<12x32xf32>
    %154 = vector.broadcast %133 : vector<1x32xf32> to vector<12x32xf32>
    %155 = arith.addf %153, %154 : vector<12x32xf32>
    %c0_79 = arith.constant 0 : index
    %c0_80 = arith.constant 0 : index
    %c0_81 = arith.constant 0 : index
    %156 = vector.load %arg13[%c0_79, %c0_80, %c0_81] : memref<2x32x64xf32, #tpu.memory_space<vmem>>, vector<1x32x64xf32>
    %157 = vector.shape_cast %156 : vector<1x32x64xf32> to vector<32x64xf32>
    %cst_82 = arith.constant dense<0.000000e+00> : vector<12x64xf32>
    %158 = tpu.matmul %155, %157, %cst_82 {dimension_numbers = #tpu.dot_dimension_numbers<[1], [0], [0], [1], [0, 0, 1, 1], [], []>} : vector<12x32xf32>, vector<32x64xf32>, vector<12x64xf32> -> vector<12x64xf32>
    %c0_83 = arith.constant 0 : index
    %c0_84 = arith.constant 0 : index
    %c0_85 = arith.constant 0 : index
    %159 = vector.load %arg14[%c0_83, %c0_84, %c0_85] : memref<2x1x64xf32, #tpu.memory_space<vmem>>, vector<1x1x64xf32>
    %160 = vector.shape_cast %159 : vector<1x1x64xf32> to vector<1x64xf32>
    %161 = vector.broadcast %160 : vector<1x64xf32> to vector<12x64xf32>
    %162 = arith.addf %158, %161 : vector<12x64xf32>
    %cst_86 = arith.constant 5.000000e-01 : f32
    %163 = vector.broadcast %cst_86 : f32 to vector<12x64xf32>
    %164 = arith.mulf %163, %162 : vector<12x64xf32>
    %cst_87 = arith.constant 4.471500e-02 : f32
    %165 = vector.broadcast %cst_87 : f32 to vector<12x64xf32>
    %166 = arith.mulf %165, %162 : vector<12x64xf32>
    %167 = arith.mulf %166, %162 : vector<12x64xf32>
    %168 = arith.mulf %167, %162 : vector<12x64xf32>
    %169 = arith.addf %162, %168 : vector<12x64xf32>
    %cst_88 = arith.constant 0.797884583 : f32
    %170 = vector.broadcast %cst_88 : f32 to vector<12x64xf32>
    %171 = arith.mulf %170, %169 : vector<12x64xf32>
    %172 = math.tanh %171 : vector<12x64xf32>
    %cst_89 = arith.constant 1.000000e+00 : f32
    %173 = vector.broadcast %cst_89 : f32 to vector<12x64xf32>
    %174 = arith.addf %173, %172 : vector<12x64xf32>
    %175 = arith.mulf %164, %174 : vector<12x64xf32>
    %c0_90 = arith.constant 0 : index
    %c0_91 = arith.constant 0 : index
    %c0_92 = arith.constant 0 : index
    %176 = vector.load %arg15[%c0_90, %c0_91, %c0_92] : memref<2x64x32xf32, #tpu.memory_space<vmem>>, vector<1x64x32xf32>
    %177 = vector.shape_cast %176 : vector<1x64x32xf32> to vector<64x32xf32>
    %cst_93 = arith.constant dense<0.000000e+00> : vector<12x32xf32>
    %178 = tpu.matmul %175, %177, %cst_93 {dimension_numbers = #tpu.dot_dimension_numbers<[1], [0], [0], [1], [0, 0, 1, 1], [], []>} : vector<12x64xf32>, vector<64x32xf32>, vector<12x32xf32> -> vector<12x32xf32>
    %c0_94 = arith.constant 0 : index
    %c0_95 = arith.constant 0 : index
    %c0_96 = arith.constant 0 : index
    %179 = vector.load %arg16[%c0_94, %c0_95, %c0_96] : memref<2x1x32xf32, #tpu.memory_space<vmem>>, vector<1x1x32xf32>
    %180 = vector.shape_cast %179 : vector<1x1x32xf32> to vector<1x32xf32>
    %181 = vector.broadcast %180 : vector<1x32xf32> to vector<12x32xf32>
    %182 = arith.addf %178, %181 : vector<12x32xf32>
    %183 = arith.addf %129, %182 : vector<12x32xf32>
    %c0_97 = arith.constant 0 : index
    %c0_98 = arith.constant 0 : index
    %184 = vector.load %arg20[%c0_97, %c0_98] : memref<12x32xf32, #tpu.memory_space<vmem>>, vector<12x32xf32>
    tpu.vector_store %arg20[%c0_97, %c0_98], %183 {strides = array<i32>} : memref<12x32xf32, #tpu.memory_space<vmem>>, vector<12x32xf32>,
    %c0_99 = arith.constant 0 : index
    %c0_100 = arith.constant 0 : index
    %185 = vector.load %arg20[%c0_99, %c0_100] : memref<12x32xf32, #tpu.memory_space<vmem>>, vector<12x32xf32>
    %c1 = arith.constant 1 : index
    %c0_101 = arith.constant 0 : index
    %c0_102 = arith.constant 0 : index
    %186 = vector.load %arg5[%c1, %c0_101, %c0_102] : memref<2x1x32xf32, #tpu.memory_space<vmem>>, vector<1x1x32xf32>
    %187 = vector.shape_cast %186 : vector<1x1x32xf32> to vector<1x32xf32>
    %c1_103 = arith.constant 1 : index
    %c0_104 = arith.constant 0 : index
    %c0_105 = arith.constant 0 : index
    %188 = vector.load %arg6[%c1_103, %c0_104, %c0_105] : memref<2x1x32xf32, #tpu.memory_space<vmem>>, vector<1x1x32xf32>
    %189 = vector.shape_cast %188 : vector<1x1x32xf32> to vector<1x32xf32>
    %cst_106 = arith.constant dense<0.000000e+00> : vector<12xf32>
    %190 = vector.multi_reduction <add>, %185, %cst_106 [1] : vector<12x32xf32> to vector<12xf32>
    %191 = vector.shape_cast %190 : vector<12xf32> to vector<12x1xf32>
    %cst_107 = arith.constant 3.200000e+01 : f32
    %192 = vector.broadcast %cst_107 : f32 to vector<12x1xf32>
    %193 = arith.divf %191, %192 : vector<12x1xf32>
    %194 = vector.broadcast %193 : vector<12x1xf32> to vector<12x32xf32>
    %195 = arith.subf %185, %194 : vector<12x32xf32>
    %196 = arith.mulf %195, %195 : vector<12x32xf32>
    %cst_108 = arith.constant dense<0.000000e+00> : vector<12xf32>
    %197 = vector.multi_reduction <add>, %196, %cst_108 [1] : vector<12x32xf32> to vector<12xf32>
    %198 = vector.shape_cast %197 : vector<12xf32> to vector<12x1xf32>
    %cst_109 = arith.constant 3.200000e+01 : f32
    %199 = vector.broadcast %cst_109 : f32 to vector<12x1xf32>
    %200 = arith.divf %198, %199 : vector<12x1xf32>
    %201 = vector.broadcast %193 : vector<12x1xf32> to vector<12x32xf32>
    %202 = arith.subf %185, %201 : vector<12x32xf32>
    %cst_110 = arith.constant 9.99999996E-13 : f32
    %203 = vector.broadcast %cst_110 : f32 to vector<12x1xf32>
    %204 = arith.addf %200, %203 : vector<12x1xf32>
    %205 = math.rsqrt %204 : vector<12x1xf32>
    %206 = vector.broadcast %205 : vector<12x1xf32> to vector<12x32xf32>
    %207 = arith.mulf %202, %206 : vector<12x32xf32>
    %208 = vector.broadcast %187 : vector<1x32xf32> to vector<12x32xf32>
    %209 = arith.mulf %207, %208 : vector<12x32xf32>
    %210 = vector.broadcast %189 : vector<1x32xf32> to vector<12x32xf32>
    %211 = arith.addf %209, %210 : vector<12x32xf32>
    %c1_111 = arith.constant 1 : index
    %c0_112 = arith.constant 0 : index
    %c0_113 = arith.constant 0 : index
    %212 = vector.load %arg7[%c1_111, %c0_112, %c0_113] : memref<2x32x96xf32, #tpu.memory_space<vmem>>, vector<1x32x96xf32>
    %213 = vector.shape_cast %212 : vector<1x32x96xf32> to vector<32x96xf32>
    %cst_114 = arith.constant dense<0.000000e+00> : vector<12x96xf32>
    %214 = tpu.matmul %211, %213, %cst_114 {dimension_numbers = #tpu.dot_dimension_numbers<[1], [0], [0], [1], [0, 0, 1, 1], [], []>} : vector<12x32xf32>, vector<32x96xf32>, vector<12x96xf32> -> vector<12x96xf32>
    %c1_115 = arith.constant 1 : index
    %c0_116 = arith.constant 0 : index
    %c0_117 = arith.constant 0 : index
    %215 = vector.load %arg8[%c1_115, %c0_116, %c0_117] : memref<2x1x96xf32, #tpu.memory_space<vmem>>, vector<1x1x96xf32>
    %216 = vector.shape_cast %215 : vector<1x1x96xf32> to vector<1x96xf32>
    %217 = vector.broadcast %216 : vector<1x96xf32> to vector<12x96xf32>
    %218 = arith.addf %214, %217 : vector<12x96xf32>
    %219 = vector.extract_strided_slice %218 {offsets = [0, 0], sizes = [6, 16], strides = [1, 1]} : vector<12x96xf32> to vector<6x16xf32>
    %220 = vector.extract_strided_slice %218 {offsets = [0, 32], sizes = [6, 16], strides = [1, 1]} : vector<12x96xf32> to vector<6x16xf32>
    %221 = vector.extract_strided_slice %218 {offsets = [0, 64], sizes = [6, 16], strides = [1, 1]} : vector<12x96xf32> to vector<6x16xf32>
    %cst_118 = arith.constant dense<0.000000e+00> : vector<6x6xf32>
    %222 = tpu.matmul %219, %220, %cst_118 {dimension_numbers = #tpu.dot_dimension_numbers<[1], [1], [0], [0], [0, 0, 1, 0], [], []>} : vector<6x16xf32>, vector<6x16xf32>, vector<6x6xf32> -> vector<6x6xf32>
    %cst_119 = arith.constant 2.500000e-01 : f32
    %223 = vector.broadcast %cst_119 : f32 to vector<6x6xf32>
    %224 = arith.mulf %222, %223 : vector<6x6xf32>
    %cst_120 = arith.constant dense<0xFF800000> : vector<6xf32>
    %225 = vector.multi_reduction <maximumf>, %224, %cst_120 [1] : vector<6x6xf32> to vector<6xf32>
    %226 = vector.shape_cast %225 : vector<6xf32> to vector<6x1xf32>
    %227 = vector.broadcast %226 : vector<6x1xf32> to vector<6x6xf32>
    %228 = arith.subf %224, %227 : vector<6x6xf32>
    %229 = math.exp %228 : vector<6x6xf32>
    %cst_121 = arith.constant dense<0.000000e+00> : vector<6xf32>
    %230 = vector.multi_reduction <add>, %229, %cst_121 [1] : vector<6x6xf32> to vector<6xf32>
    %231 = vector.shape_cast %230 : vector<6xf32> to vector<6x1xf32>
    %232 = vector.broadcast %231 : vector<6x1xf32> to vector<6x6xf32>
    %233 = arith.divf %229, %232 : vector<6x6xf32>
    %cst_122 = arith.constant dense<0.000000e+00> : vector<6x16xf32>
    %234 = tpu.matmul %233, %221, %cst_122 {dimension_numbers = #tpu.dot_dimension_numbers<[1], [0], [0], [1], [0, 0, 1, 1], [], []>} : vector<6x6xf32>, vector<6x16xf32>, vector<6x16xf32> -> vector<6x16xf32>
    %c0_123 = arith.constant 0 : index
    %c0_124 = arith.constant 0 : index
    %235 = vector.load %arg21[%c0_123, %c0_124] : memref<12x32xf32, #tpu.memory_space<vmem>>, vector<6x16xf32>
    tpu.vector_store %arg21[%c0_123, %c0_124], %234 {strides = array<i32>} : memref<12x32xf32, #tpu.memory_space<vmem>>, vector<6x16xf32>,
    %236 = vector.extract_strided_slice %218 {offsets = [0, 16], sizes = [6, 16], strides = [1, 1]} : vector<12x96xf32> to vector<6x16xf32>
    %237 = vector.extract_strided_slice %218 {offsets = [0, 48], sizes = [6, 16], strides = [1, 1]} : vector<12x96xf32> to vector<6x16xf32>
    %238 = vector.extract_strided_slice %218 {offsets = [0, 80], sizes = [6, 16], strides = [1, 1]} : vector<12x96xf32> to vector<6x16xf32>
    %cst_125 = arith.constant dense<0.000000e+00> : vector<6x6xf32>
    %239 = tpu.matmul %236, %237, %cst_125 {dimension_numbers = #tpu.dot_dimension_numbers<[1], [1], [0], [0], [0, 0, 1, 0], [], []>} : vector<6x16xf32>, vector<6x16xf32>, vector<6x6xf32> -> vector<6x6xf32>
    %cst_126 = arith.constant 2.500000e-01 : f32
    %240 = vector.broadcast %cst_126 : f32 to vector<6x6xf32>
    %241 = arith.mulf %239, %240 : vector<6x6xf32>
    %cst_127 = arith.constant dense<0xFF800000> : vector<6xf32>
    %242 = vector.multi_reduction <maximumf>, %241, %cst_127 [1] : vector<6x6xf32> to vector<6xf32>
    %243 = vector.shape_cast %242 : vector<6xf32> to vector<6x1xf32>
    %244 = vector.broadcast %243 : vector<6x1xf32> to vector<6x6xf32>
    %245 = arith.subf %241, %244 : vector<6x6xf32>
    %246 = math.exp %245 : vector<6x6xf32>
    %cst_128 = arith.constant dense<0.000000e+00> : vector<6xf32>
    %247 = vector.multi_reduction <add>, %246, %cst_128 [1] : vector<6x6xf32> to vector<6xf32>
    %248 = vector.shape_cast %247 : vector<6xf32> to vector<6x1xf32>
    %249 = vector.broadcast %248 : vector<6x1xf32> to vector<6x6xf32>
    %250 = arith.divf %246, %249 : vector<6x6xf32>
    %cst_129 = arith.constant dense<0.000000e+00> : vector<6x16xf32>
    %251 = tpu.matmul %250, %238, %cst_129 {dimension_numbers = #tpu.dot_dimension_numbers<[1], [0], [0], [1], [0, 0, 1, 1], [], []>} : vector<6x6xf32>, vector<6x16xf32>, vector<6x16xf32> -> vector<6x16xf32>
    %c0_130 = arith.constant 0 : index
    %c16_131 = arith.constant 16 : index
    %252 = vector.load %arg21[%c0_130, %c16_131] : memref<12x32xf32, #tpu.memory_space<vmem>>, vector<6x16xf32>
    tpu.vector_store %arg21[%c0_130, %c16_131], %251 {strides = array<i32>} : memref<12x32xf32, #tpu.memory_space<vmem>>, vector<6x16xf32>,
    %253 = vector.extract_strided_slice %218 {offsets = [6, 0], sizes = [6, 16], strides = [1, 1]} : vector<12x96xf32> to vector<6x16xf32>
    %254 = vector.extract_strided_slice %218 {offsets = [6, 32], sizes = [6, 16], strides = [1, 1]} : vector<12x96xf32> to vector<6x16xf32>
    %255 = vector.extract_strided_slice %218 {offsets = [6, 64], sizes = [6, 16], strides = [1, 1]} : vector<12x96xf32> to vector<6x16xf32>
    %cst_132 = arith.constant dense<0.000000e+00> : vector<6x6xf32>
    %256 = tpu.matmul %253, %254, %cst_132 {dimension_numbers = #tpu.dot_dimension_numbers<[1], [1], [0], [0], [0, 0, 1, 0], [], []>} : vector<6x16xf32>, vector<6x16xf32>, vector<6x6xf32> -> vector<6x6xf32>
    %cst_133 = arith.constant 2.500000e-01 : f32
    %257 = vector.broadcast %cst_133 : f32 to vector<6x6xf32>
    %258 = arith.mulf %256, %257 : vector<6x6xf32>
    %cst_134 = arith.constant dense<0xFF800000> : vector<6xf32>
    %259 = vector.multi_reduction <maximumf>, %258, %cst_134 [1] : vector<6x6xf32> to vector<6xf32>
    %260 = vector.shape_cast %259 : vector<6xf32> to vector<6x1xf32>
    %261 = vector.broadcast %260 : vector<6x1xf32> to vector<6x6xf32>
    %262 = arith.subf %258, %261 : vector<6x6xf32>
    %263 = math.exp %262 : vector<6x6xf32>
    %cst_135 = arith.constant dense<0.000000e+00> : vector<6xf32>
    %264 = vector.multi_reduction <add>, %263, %cst_135 [1] : vector<6x6xf32> to vector<6xf32>
    %265 = vector.shape_cast %264 : vector<6xf32> to vector<6x1xf32>
    %266 = vector.broadcast %265 : vector<6x1xf32> to vector<6x6xf32>
    %267 = arith.divf %263, %266 : vector<6x6xf32>
    %cst_136 = arith.constant dense<0.000000e+00> : vector<6x16xf32>
    %268 = tpu.matmul %267, %255, %cst_136 {dimension_numbers = #tpu.dot_dimension_numbers<[1], [0], [0], [1], [0, 0, 1, 1], [], []>} : vector<6x6xf32>, vector<6x16xf32>, vector<6x16xf32> -> vector<6x16xf32>
    %c6_137 = arith.constant 6 : index
    %c0_138 = arith.constant 0 : index
    %269 = vector.load %arg21[%c6_137, %c0_138] : memref<12x32xf32, #tpu.memory_space<vmem>>, vector<6x16xf32>
    tpu.vector_store %arg21[%c6_137, %c0_138], %268 {strides = array<i32>} : memref<12x32xf32, #tpu.memory_space<vmem>>, vector<6x16xf32>,
    %270 = vector.extract_strided_slice %218 {offsets = [6, 16], sizes = [6, 16], strides = [1, 1]} : vector<12x96xf32> to vector<6x16xf32>
    %271 = vector.extract_strided_slice %218 {offsets = [6, 48], sizes = [6, 16], strides = [1, 1]} : vector<12x96xf32> to vector<6x16xf32>
    %272 = vector.extract_strided_slice %218 {offsets = [6, 80], sizes = [6, 16], strides = [1, 1]} : vector<12x96xf32> to vector<6x16xf32>
    %cst_139 = arith.constant dense<0.000000e+00> : vector<6x6xf32>
    %273 = tpu.matmul %270, %271, %cst_139 {dimension_numbers = #tpu.dot_dimension_numbers<[1], [1], [0], [0], [0, 0, 1, 0], [], []>} : vector<6x16xf32>, vector<6x16xf32>, vector<6x6xf32> -> vector<6x6xf32>
    %cst_140 = arith.constant 2.500000e-01 : f32
    %274 = vector.broadcast %cst_140 : f32 to vector<6x6xf32>
    %275 = arith.mulf %273, %274 : vector<6x6xf32>
    %cst_141 = arith.constant dense<0xFF800000> : vector<6xf32>
    %276 = vector.multi_reduction <maximumf>, %275, %cst_141 [1] : vector<6x6xf32> to vector<6xf32>
    %277 = vector.shape_cast %276 : vector<6xf32> to vector<6x1xf32>
    %278 = vector.broadcast %277 : vector<6x1xf32> to vector<6x6xf32>
    %279 = arith.subf %275, %278 : vector<6x6xf32>
    %280 = math.exp %279 : vector<6x6xf32>
    %cst_142 = arith.constant dense<0.000000e+00> : vector<6xf32>
    %281 = vector.multi_reduction <add>, %280, %cst_142 [1] : vector<6x6xf32> to vector<6xf32>
    %282 = vector.shape_cast %281 : vector<6xf32> to vector<6x1xf32>
    %283 = vector.broadcast %282 : vector<6x1xf32> to vector<6x6xf32>
    %284 = arith.divf %280, %283 : vector<6x6xf32>
    %cst_143 = arith.constant dense<0.000000e+00> : vector<6x16xf32>
    %285 = tpu.matmul %284, %272, %cst_143 {dimension_numbers = #tpu.dot_dimension_numbers<[1], [0], [0], [1], [0, 0, 1, 1], [], []>} : vector<6x6xf32>, vector<6x16xf32>, vector<6x16xf32> -> vector<6x16xf32>
    %c6_144 = arith.constant 6 : index
    %c16_145 = arith.constant 16 : index
    %286 = vector.load %arg21[%c6_144, %c16_145] : memref<12x32xf32, #tpu.memory_space<vmem>>, vector<6x16xf32>
    tpu.vector_store %arg21[%c6_144, %c16_145], %285 {strides = array<i32>} : memref<12x32xf32, #tpu.memory_space<vmem>>, vector<6x16xf32>,
    %c0_146 = arith.constant 0 : index
    %c0_147 = arith.constant 0 : index
    %287 = vector.load %arg21[%c0_146, %c0_147] : memref<12x32xf32, #tpu.memory_space<vmem>>, vector<12x32xf32>
    %c1_148 = arith.constant 1 : index
    %c0_149 = arith.constant 0 : index
    %c0_150 = arith.constant 0 : index
    %288 = vector.load %arg9[%c1_148, %c0_149, %c0_150] : memref<2x32x32xf32, #tpu.memory_space<vmem>>, vector<1x32x32xf32>
    %289 = vector.shape_cast %288 : vector<1x32x32xf32> to vector<32x32xf32>
    %cst_151 = arith.constant dense<0.000000e+00> : vector<12x32xf32>
    %290 = tpu.matmul %287, %289, %cst_151 {dimension_numbers = #tpu.dot_dimension_numbers<[1], [0], [0], [1], [0, 0, 1, 1], [], []>} : vector<12x32xf32>, vector<32x32xf32>, vector<12x32xf32> -> vector<12x32xf32>
    %c1_152 = arith.constant 1 : index
    %c0_153 = arith.constant 0 : index
    %c0_154 = arith.constant 0 : index
    %291 = vector.load %arg10[%c1_152, %c0_153, %c0_154] : memref<2x1x32xf32, #tpu.memory_space<vmem>>, vector<1x1x32xf32>
    %292 = vector.shape_cast %291 : vector<1x1x32xf32> to vector<1x32xf32>
    %293 = vector.broadcast %292 : vector<1x32xf32> to vector<12x32xf32>
    %294 = arith.addf %290, %293 : vector<12x32xf32>
    %295 = arith.addf %185, %294 : vector<12x32xf32>
    %c1_155 = arith.constant 1 : index
    %c0_156 = arith.constant 0 : index
    %c0_157 = arith.constant 0 : index
    %296 = vector.load %arg11[%c1_155, %c0_156, %c0_157] : memref<2x1x32xf32, #tpu.memory_space<vmem>>, vector<1x1x32xf32>
    %297 = vector.shape_cast %296 : vector<1x1x32xf32> to vector<1x32xf32>
    %c1_158 = arith.constant 1 : index
    %c0_159 = arith.constant 0 : index
    %c0_160 = arith.constant 0 : index
    %298 = vector.load %arg12[%c1_158, %c0_159, %c0_160] : memref<2x1x32xf32, #tpu.memory_space<vmem>>, vector<1x1x32xf32>
    %299 = vector.shape_cast %298 : vector<1x1x32xf32> to vector<1x32xf32>
    %cst_161 = arith.constant dense<0.000000e+00> : vector<12xf32>
    %300 = vector.multi_reduction <add>, %295, %cst_161 [1] : vector<12x32xf32> to vector<12xf32>
    %301 = vector.shape_cast %300 : vector<12xf32> to vector<12x1xf32>
    %cst_162 = arith.constant 3.200000e+01 : f32
    %302 = vector.broadcast %cst_162 : f32 to vector<12x1xf32>
    %303 = arith.divf %301, %302 : vector<12x1xf32>
    %304 = vector.broadcast %303 : vector<12x1xf32> to vector<12x32xf32>
    %305 = arith.subf %295, %304 : vector<12x32xf32>
    %306 = arith.mulf %305, %305 : vector<12x32xf32>
    %cst_163 = arith.constant dense<0.000000e+00> : vector<12xf32>
    %307 = vector.multi_reduction <add>, %306, %cst_163 [1] : vector<12x32xf32> to vector<12xf32>
    %308 = vector.shape_cast %307 : vector<12xf32> to vector<12x1xf32>
    %cst_164 = arith.constant 3.200000e+01 : f32
    %309 = vector.broadcast %cst_164 : f32 to vector<12x1xf32>
    %310 = arith.divf %308, %309 : vector<12x1xf32>
    %311 = vector.broadcast %303 : vector<12x1xf32> to vector<12x32xf32>
    %312 = arith.subf %295, %311 : vector<12x32xf32>
    %cst_165 = arith.constant 9.99999996E-13 : f32
    %313 = vector.broadcast %cst_165 : f32 to vector<12x1xf32>
    %314 = arith.addf %310, %313 : vector<12x1xf32>
    %315 = math.rsqrt %314 : vector<12x1xf32>
    %316 = vector.broadcast %315 : vector<12x1xf32> to vector<12x32xf32>
    %317 = arith.mulf %312, %316 : vector<12x32xf32>
    %318 = vector.broadcast %297 : vector<1x32xf32> to vector<12x32xf32>
    %319 = arith.mulf %317, %318 : vector<12x32xf32>
    %320 = vector.broadcast %299 : vector<1x32xf32> to vector<12x32xf32>
    %321 = arith.addf %319, %320 : vector<12x32xf32>
    %c1_166 = arith.constant 1 : index
    %c0_167 = arith.constant 0 : index
    %c0_168 = arith.constant 0 : index
    %322 = vector.load %arg13[%c1_166, %c0_167, %c0_168] : memref<2x32x64xf32, #tpu.memory_space<vmem>>, vector<1x32x64xf32>
    %323 = vector.shape_cast %322 : vector<1x32x64xf32> to vector<32x64xf32>
    %cst_169 = arith.constant dense<0.000000e+00> : vector<12x64xf32>
    %324 = tpu.matmul %321, %323, %cst_169 {dimension_numbers = #tpu.dot_dimension_numbers<[1], [0], [0], [1], [0, 0, 1, 1], [], []>} : vector<12x32xf32>, vector<32x64xf32>, vector<12x64xf32> -> vector<12x64xf32>
    %c1_170 = arith.constant 1 : index
    %c0_171 = arith.constant 0 : index
    %c0_172 = arith.constant 0 : index
    %325 = vector.load %arg14[%c1_170, %c0_171, %c0_172] : memref<2x1x64xf32, #tpu.memory_space<vmem>>, vector<1x1x64xf32>
    %326 = vector.shape_cast %325 : vector<1x1x64xf32> to vector<1x64xf32>
    %327 = vector.broadcast %326 : vector<1x64xf32> to vector<12x64xf32>
    %328 = arith.addf %324, %327 : vector<12x64xf32>
    %cst_173 = arith.constant 5.000000e-01 : f32
    %329 = vector.broadcast %cst_173 : f32 to vector<12x64xf32>
    %330 = arith.mulf %329, %328 : vector<12x64xf32>
    %cst_174 = arith.constant 4.471500e-02 : f32
    %331 = vector.broadcast %cst_174 : f32 to vector<12x64xf32>
    %332 = arith.mulf %331, %328 : vector<12x64xf32>
    %333 = arith.mulf %332, %328 : vector<12x64xf32>
    %334 = arith.mulf %333, %328 : vector<12x64xf32>
    %335 = arith.addf %328, %334 : vector<12x64xf32>
    %cst_175 = arith.constant 0.797884583 : f32
    %336 = vector.broadcast %cst_175 : f32 to vector<12x64xf32>
    %337 = arith.mulf %336, %335 : vector<12x64xf32>
    %338 = math.tanh %337 : vector<12x64xf32>
    %cst_176 = arith.constant 1.000000e+00 : f32
    %339 = vector.broadcast %cst_176 : f32 to vector<12x64xf32>
    %340 = arith.addf %339, %338 : vector<12x64xf32>
    %341 = arith.mulf %330, %340 : vector<12x64xf32>
    %c1_177 = arith.constant 1 : index
    %c0_178 = arith.constant 0 : index
    %c0_179 = arith.constant 0 : index
    %342 = vector.load %arg15[%c1_177, %c0_178, %c0_179] : memref<2x64x32xf32, #tpu.memory_space<vmem>>, vector<1x64x32xf32>
    %343 = vector.shape_cast %342 : vector<1x64x32xf32> to vector<64x32xf32>
    %cst_180 = arith.constant dense<0.000000e+00> : vector<12x32xf32>
    %344 = tpu.matmul %341, %343, %cst_180 {dimension_numbers = #tpu.dot_dimension_numbers<[1], [0], [0], [1], [0, 0, 1, 1], [], []>} : vector<12x64xf32>, vector<64x32xf32>, vector<12x32xf32> -> vector<12x32xf32>
    %c1_181 = arith.constant 1 : index
    %c0_182 = arith.constant 0 : index
    %c0_183 = arith.constant 0 : index
    %345 = vector.load %arg16[%c1_181, %c0_182, %c0_183] : memref<2x1x32xf32, #tpu.memory_space<vmem>>, vector<1x1x32xf32>
    %346 = vector.shape_cast %345 : vector<1x1x32xf32> to vector<1x32xf32>
    %347 = vector.broadcast %346 : vector<1x32xf32> to vector<12x32xf32>
    %348 = arith.addf %344, %347 : vector<12x32xf32>
    %349 = arith.addf %295, %348 : vector<12x32xf32>
    %c0_184 = arith.constant 0 : index
    %c0_185 = arith.constant 0 : index
    %350 = vector.load %arg20[%c0_184, %c0_185] : memref<12x32xf32, #tpu.memory_space<vmem>>, vector<12x32xf32>
    tpu.vector_store %arg20[%c0_184, %c0_185], %349 {strides = array<i32>} : memref<12x32xf32, #tpu.memory_space<vmem>>, vector<12x32xf32>,
    %c0_186 = arith.constant 0 : index
    %c0_187 = arith.constant 0 : index
    %351 = vector.load %arg17[%c0_186, %c0_187] : memref<1x32xf32, #tpu.memory_space<vmem>>, vector<1x32xf32>
    %c0_188 = arith.constant 0 : index
    %c0_189 = arith.constant 0 : index
    %352 = vector.load %arg18[%c0_188, %c0_189] : memref<1x32xf32, #tpu.memory_space<vmem>>, vector<1x32xf32>
    %c0_190 = arith.constant 0 : index
    %c0_191 = arith.constant 0 : index
    %353 = vector.load %arg20[%c0_190, %c0_191] : memref<12x32xf32, #tpu.memory_space<vmem>>, vector<1x32xf32>
    %cst_192 = arith.constant dense<0.000000e+00> : vector<1xf32>
    %354 = vector.multi_reduction <add>, %353, %cst_192 [1] : vector<1x32xf32> to vector<1xf32>
    %355 = vector.shape_cast %354 : vector<1xf32> to vector<1x1xf32>
    %cst_193 = arith.constant 3.200000e+01 : f32
    %356 = vector.broadcast %cst_193 : f32 to vector<1x1xf32>
    %357 = arith.divf %355, %356 : vector<1x1xf32>
    %358 = vector.broadcast %357 : vector<1x1xf32> to vector<1x32xf32>
    %359 = arith.subf %353, %358 : vector<1x32xf32>
    %360 = arith.mulf %359, %359 : vector<1x32xf32>
    %cst_194 = arith.constant dense<0.000000e+00> : vector<1xf32>
    %361 = vector.multi_reduction <add>, %360, %cst_194 [1] : vector<1x32xf32> to vector<1xf32>
    %362 = vector.shape_cast %361 : vector<1xf32> to vector<1x1xf32>
    %cst_195 = arith.constant 3.200000e+01 : f32
    %363 = vector.broadcast %cst_195 : f32 to vector<1x1xf32>
    %364 = arith.divf %362, %363 : vector<1x1xf32>
    %365 = vector.broadcast %357 : vector<1x1xf32> to vector<1x32xf32>
    %366 = arith.subf %353, %365 : vector<1x32xf32>
    %cst_196 = arith.constant 9.99999996E-13 : f32
    %367 = vector.broadcast %cst_196 : f32 to vector<1x1xf32>
    %368 = arith.addf %364, %367 : vector<1x1xf32>
    %369 = math.rsqrt %368 : vector<1x1xf32>
    %370 = vector.broadcast %369 : vector<1x1xf32> to vector<1x32xf32>
    %371 = arith.mulf %366, %370 : vector<1x32xf32>
    %372 = arith.mulf %371, %351 : vector<1x32xf32>
    %373 = arith.addf %372, %352 : vector<1x32xf32>
    %c0_197 = arith.constant 0 : index
    %c0_198 = arith.constant 0 : index
    %374 = vector.load %arg19[%c0_197, %c0_198] : memref<2x32xf32, #tpu.memory_space<vmem>>, vector<1x32xf32>
    tpu.vector_store %arg19[%c0_197, %c0_198], %373 {strides = array<i32>} : memref<2x32xf32, #tpu.memory_space<vmem>>, vector<1x32xf32>,
    %c6_199 = arith.constant 6 : index
    %c0_200 = arith.constant 0 : index
    %375 = vector.load %arg20[%c6_199, %c0_200] : memref<12x32xf32, #tpu.memory_space<vmem>>, vector<1x32xf32>
    %cst_201 = arith.constant dense<0.000000e+00> : vector<1xf32>
    %376 = vector.multi_reduction <add>, %375, %cst_201 [1] : vector<1x32xf32> to vector<1xf32>
    %377 = vector.shape_cast %376 : vector<1xf32> to vector<1x1xf32>
    %cst_202 = arith.constant 3.200000e+01 : f32
    %378 = vector.broadcast %cst_202 : f32 to vector<1x1xf32>
    %379 = arith.divf %377, %378 : vector<1x1xf32>
    %380 = vector.broadcast %379 : vector<1x1xf32> to vector<1x32xf32>
    %381 = arith.subf %375, %380 : vector<1x32xf32>
    %382 = arith.mulf %381, %381 : vector<1x32xf32>
    %cst_203 = arith.constant dense<0.000000e+00> : vector<1xf32>
    %383 = vector.multi_reduction <add>, %382, %cst_203 [1] : vector<1x32xf32> to vector<1xf32>
    %384 = vector.shape_cast %383 : vector<1xf32> to vector<1x1xf32>
    %cst_204 = arith.constant 3.200000e+01 : f32
    %385 = vector.broadcast %cst_204 : f32 to vector<1x1xf32>
    %386 = arith.divf %384, %385 : vector<1x1xf32>
    %387 = vector.broadcast %379 : vector<1x1xf32> to vector<1x32xf32>
    %388 = arith.subf %375, %387 : vector<1x32xf32>
    %cst_205 = arith.constant 9.99999996E-13 : f32
    %389 = vector.broadcast %cst_205 : f32 to vector<1x1xf32>
    %390 = arith.addf %386, %389 : vector<1x1xf32>
    %391 = math.rsqrt %390 : vector<1x1xf32>
    %392 = vector.broadcast %391 : vector<1x1xf32> to vector<1x32xf32>
    %393 = arith.mulf %388, %392 : vector<1x32xf32>
    %394 = arith.mulf %393, %351 : vector<1x32xf32>
    %395 = arith.addf %394, %352 : vector<1x32xf32>
    %c1_206 = arith.constant 1 : index
    %c0_207 = arith.constant 0 : index
    %396 = vector.load %arg19[%c1_206, %c0_207] : memref<2x32xf32, #tpu.memory_space<vmem>>, vector<1x32xf32>
    tpu.vector_store %arg19[%c1_206, %c0_207], %395 {strides = array<i32>} : memref<2x32xf32, #tpu.memory_space<vmem>>, vector<1x32xf32>,
    return
  }
  func.func @transform_0(%arg0: i32) -> (i32, i32) {
    %c0_i32 = arith.constant 0 : i32
    %c0_i32_0 = arith.constant 0 : i32
    %c0_i32_1 = arith.constant 0 : i32
    return %c0_i32, %c0_i32_0 : i32, i32
  }
  func.func @transform_1(%arg0: i32) -> (i32, i32) {
    %c0_i32 = arith.constant 0 : i32
    %c0_i32_0 = arith.constant 0 : i32
    %c0_i32_1 = arith.constant 0 : i32
    return %c0_i32, %c0_i32_0 : i32, i32
  }
  func.func @transform_2(%arg0: i32) -> (i32, i32) {
    %c0_i32 = arith.constant 0 : i32
    %c0_i32_0 = arith.constant 0 : i32
    %c0_i32_1 = arith.constant 0 : i32
    return %c0_i32, %c0_i32_0 : i32, i32
  }
  func.func @transform_3(%arg0: i32) -> (i32, i32) {
    %c0_i32 = arith.constant 0 : i32
    %c0_i32_0 = arith.constant 0 : i32
    %c0_i32_1 = arith.constant 0 : i32
    return %c0_i32, %c0_i32_0 : i32, i32
  }
  func.func @transform_4(%arg0: i32) -> (i32, i32, i32) {
    %c0_i32 = arith.constant 0 : i32
    %c0_i32_0 = arith.constant 0 : i32
    %c0_i32_1 = arith.constant 0 : i32
    %c0_i32_2 = arith.constant 0 : i32
    return %c0_i32, %c0_i32_0, %c0_i32_1 : i32, i32, i32
  }
  func.func @transform_5(%arg0: i32) -> (i32, i32, i32) {
    %c0_i32 = arith.constant 0 : i32
    %c0_i32_0 = arith.constant 0 : i32
    %c0_i32_1 = arith.constant 0 : i32
    %c0_i32_2 = arith.constant 0 : i32
    return %c0_i32, %c0_i32_0, %c0_i32_1 : i32, i32, i32
  }
  func.func @transform_6(%arg0: i32) -> (i32, i32, i32) {
    %c0_i32 = arith.constant 0 : i32
    %c0_i32_0 = arith.constant 0 : i32
    %c0_i32_1 = arith.constant 0 : i32
    %c0_i32_2 = arith.constant 0 : i32
    return %c0_i32, %c0_i32_0, %c0_i32_1 : i32, i32, i32
  }
  func.func @transform_7(%arg0: i32) -> (i32, i32, i32) {
    %c0_i32 = arith.constant 0 : i32
    %c0_i32_0 = arith.constant 0 : i32
    %c0_i32_1 = arith.constant 0 : i32
    %c0_i32_2 = arith.constant 0 : i32
    return %c0_i32, %c0_i32_0, %c0_i32_1 : i32, i32, i32
  }
  func.func @transform_8(%arg0: i32) -> (i32, i32, i32) {
    %c0_i32 = arith.constant 0 : i32
    %c0_i32_0 = arith.constant 0 : i32
    %c0_i32_1 = arith.constant 0 : i32
    %c0_i32_2 = arith.constant 0 : i32
    return %c0_i32, %c0_i32_0, %c0_i32_1 : i32, i32, i32
  }
  func.func @transform_9(%arg0: i32) -> (i32, i32, i32) {
    %c0_i32 = arith.constant 0 : i32
    %c0_i32_0 = arith.constant 0 : i32
    %c0_i32_1 = arith.constant 0 : i32
    %c0_i32_2 = arith.constant 0 : i32
    return %c0_i32, %c0_i32_0, %c0_i32_1 : i32, i32, i32
  }
  func.func @transform_10(%arg0: i32) -> (i32, i32, i32) {
    %c0_i32 = arith.constant 0 : i32
    %c0_i32_0 = arith.constant 0 : i32
    %c0_i32_1 = arith.constant 0 : i32
    %c0_i32_2 = arith.constant 0 : i32
    return %c0_i32, %c0_i32_0, %c0_i32_1 : i32, i32, i32
  }
  func.func @transform_11(%arg0: i32) -> (i32, i32, i32) {
    %c0_i32 = arith.constant 0 : i32
    %c0_i32_0 = arith.constant 0 : i32
    %c0_i32_1 = arith.constant 0 : i32
    %c0_i32_2 = arith.constant 0 : i32
    return %c0_i32, %c0_i32_0, %c0_i32_1 : i32, i32, i32
  }
  func.func @transform_12(%arg0: i32) -> (i32, i32, i32) {
    %c0_i32 = arith.constant 0 : i32
    %c0_i32_0 = arith.constant 0 : i32
    %c0_i32_1 = arith.constant 0 : i32
    %c0_i32_2 = arith.constant 0 : i32
    return %c0_i32, %c0_i32_0, %c0_i32_1 : i32, i32, i32
  }
  func.func @transform_13(%arg0: i32) -> (i32, i32, i32) {
    %c0_i32 = arith.constant 0 : i32
    %c0_i32_0 = arith.constant 0 : i32
    %c0_i32_1 = arith.constant 0 : i32
    %c0_i32_2 = arith.constant 0 : i32
    return %c0_i32, %c0_i32_0, %c0_i32_1 : i32, i32, i32
  }
  func.func @transform_14(%arg0: i32) -> (i32, i32, i32) {
    %c0_i32 = arith.constant 0 : i32
    %c0_i32_0 = arith.constant 0 : i32
    %c0_i32_1 = arith.constant 0 : i32
    %c0_i32_2 = arith.constant 0 : i32
    return %c0_i32, %c0_i32_0, %c0_i32_1 : i32, i32, i32
  }
  func.func @transform_15(%arg0: i32) -> (i32, i32, i32) {
    %c0_i32 = arith.constant 0 : i32
    %c0_i32_0 = arith.constant 0 : i32
    %c0_i32_1 = arith.constant 0 : i32
    %c0_i32_2 = arith.constant 0 : i32
    return %c0_i32, %c0_i32_0, %c0_i32_1 : i32, i32, i32
  }
  func.func @transform_16(%arg0: i32) -> (i32, i32) {
    %c0_i32 = arith.constant 0 : i32
    %c0_i32_0 = arith.constant 0 : i32
    %c0_i32_1 = arith.constant 0 : i32
    return %c0_i32, %c0_i32_0 : i32, i32
  }
  func.func @transform_17(%arg0: i32) -> (i32, i32) {
    %c0_i32 = arith.constant 0 : i32
    %c0_i32_0 = arith.constant 0 : i32
    %c0_i32_1 = arith.constant 0 : i32
    return %c0_i32, %c0_i32_0 : i32, i32
  }
  func.func @transform_18(%arg0: i32) -> (i32, i32) {
    %c0_i32 = arith.constant 0 : i32
    %c0_i32_0 = arith.constant 0 : i32
    %c0_i32_1 = arith.constant 0 : i32
    return %c0_i32, %c0_i32_0 : i32, i32
  }
}

</mosaic_0001>

<bundles_post_ra>
// kernel: tpu_custom_call.1
= control target key start
LH: loop header
LB: loop body
LE: loop exit
PB: predicated region body
PF: predicated region fallthrough
CT: control target
= control target key end

     0   :  { %s4384_s0 = inlined_call_operand.vmem [shape: f32[8,768], index: 0, kind: input, shape index: {}]   ;;  %s4385_s1 = inlined_call_operand.vmem [shape: f32[768,32], index: 1, kind: input, shape index: {}]   ;;  %s4386_s2 = inlined_call_operand.vmem [shape: f32[1,32], index: 2, kind: input, shape index: {}]   ;;  %s4387_s3 = inlined_call_operand.vmem [shape: f32[6,32], index: 3, kind: input, shape index: {}]   ;;  %s4388_s4 = inlined_call_operand.vmem [shape: f32[2,1,32], index: 4, kind: input, shape index: {}]   ;;  %s4389_s5 = inlined_call_operand.vmem [shape: f32[2,1,32], index: 5, kind: input, shape index: {}]   ;;  %s4390_s6 = inlined_call_operand.vmem [shape: f32[2,32,96], index: 6, kind: input, shape index: {}]   ;;  %s4391_s7 = inlined_call_operand.vmem [shape: f32[2,1,96], index: 7, kind: input, shape index: {}]   ;;  %s4392_s8 = inlined_call_operand.vmem [shape: f32[2,32,32], index: 8, kind: input, shape index: {}]   ;;  %s4393_s9 = inlined_call_operand.vmem [shape: f32[2,1,32], index: 9, kind: input, shape index: {}]   ;;  %s4394_s10 = inlined_call_operand.vmem [shape: f32[2,1,32], index: 10, kind: input, shape index: {}]   ;;  %s4395_s11 = inlined_call_operand.vmem [shape: f32[2,1,32], index: 11, kind: input, shape index: {}]   ;;  %s4396_s12 = inlined_call_operand.vmem [shape: f32[2,32,64], index: 12, kind: input, shape index: {}]   ;;  %s4397_s13 = inlined_call_operand.vmem [shape: f32[2,1,64], index: 13, kind: input, shape index: {}]   ;;  %s4398_s14 = inlined_call_operand.vmem [shape: f32[2,64,32], index: 14, kind: input, shape index: {}]   ;;  %s4399_s15 = inlined_call_operand.vmem [shape: f32[2,1,32], index: 15, kind: input, shape index: {}]   ;;  %s4400_s16 = inlined_call_operand.vmem [shape: f32[1,32], index: 16, kind: input, shape index: {}]   ;;  %s4401_s17 = inlined_call_operand.vmem [shape: f32[1,32], index: 17, kind: input, shape index: {}]   ;;  %s4402_s18 = inlined_call_operand.hbm [shape: f32[2,32], index: 18, kind: output, shape index: {}]  }
   0x1   :  { %4405 = sst [smem:[#allocation7_spill]] %s4384_s0 }
   0x2   :  { %4406 = sst [smem:[#allocation8_spill]] %s4385_s1 }
   0x3   :  { %4407 = sst [smem:[#allocation9_spill]] %s4386_s2 }
   0x4   :  { %s4408_s29 = sld [smem:[#allocation8_spill]]  ;;  %s4409_s23 = sld [smem:[#allocation7_spill]] }
   0xa   :  { %v82_v0 = vld [vmem:[%s4408_s29 + $0x80] sm:$0xff]  ;;  %v83_v1 = vld [vmem:[%s4408_s29 + $0x88] sm:$0xff]  ;;  %v84_v11 = vld [vmem:[%s4408_s29 + $0x90] sm:$0xff] }
   0xb   :  { %v66_v2 = vld [vmem:[%s4408_s29] sm:$0xff]  ;;  %v3275_v3 = vpack.c.bf16 %v83_v1, %v82_v0  ;;  %v67_v4 = vld [vmem:[%s4408_s29 + $0x8] sm:$0xff]  ;;  %v85_v13 = vld [vmem:[%s4408_s29 + $0x98] sm:$0xff] }
   0xc   :  { %v114_v5 = vld [vmem:[%s4408_s29 + $0x180] sm:$0xff]  ;;  %v115_v6 = vld [vmem:[%s4408_s29 + $0x188] sm:$0xff]  ;;  %v3277_v7 = vpack.c.bf16 %v67_v4, %v66_v2  ;;  %v68_v14 = vld [vmem:[%s4408_s29 + $0x10] sm:$0xff]  ;;  %v3279_v16 = vpack.c.bf16 %v85_v13, %v84_v11 }
   0xd   :  { %v3307_v8 = vpack.c.bf16 %v115_v6, %v114_v5  ;;  %v98_v9 = vld [vmem:[%s4408_s29 + $0x100] sm:$0xff]  ;;  %v99_v10 = vld [vmem:[%s4408_s29 + $0x108] sm:$0xff]  ;;  %3276 = vmatprep.subr.bf16.mxu0 %v3275_v3  ;;  %v69_v15 = vld [vmem:[%s4408_s29 + $0x18] sm:$0xff] }
   0xe   :  { %v3309_v12 = vpack.c.bf16 %v99_v10, %v98_v9  ;;  %3278 = vmatpush3.bf16.msra.mxu0 %v3277_v7  ;;  %v3281_v17 = vpack.c.bf16 %v69_v15, %v68_v14  ;;  %v116_v18 = vld [vmem:[%s4408_s29 + $0x190] sm:$0xff]  ;;  %v117_v19 = vld [vmem:[%s4408_s29 + $0x198] sm:$0xff]  ;;  %v86_v23 = vld [vmem:[%s4408_s29 + $0xa0] sm:$0xff] }
   0xf   :  { %3308 = vmatprep.subr.bf16.mxu1 %v3307_v8  ;;  %v100_v20 = vld [vmem:[%s4408_s29 + $0x110] sm:$0xff]  ;;  %v3311_v21 = vpack.c.bf16 %v117_v19, %v116_v18  ;;  %v101_v22 = vld [vmem:[%s4408_s29 + $0x118] sm:$0xff]  ;;  %v87_v24 = vld [vmem:[%s4408_s29 + $0xa8] sm:$0xff]  ;;  %3280 = vmatprep.subr.bf16.mxu0 %v3279_v16 }
  0x10   :  { %3310 = vmatpush3.bf16.msra.mxu1 %v3309_v12  ;;  %v3313_v25 = vpack.c.bf16 %v101_v22, %v100_v20  ;;  %v3283_v26 = vpack.c.bf16 %v87_v24, %v86_v23  ;;  %v70_v27 = vld [vmem:[%s4408_s29 + $0x20] sm:$0xff]  ;;  %v71_v28 = vld [vmem:[%s4408_s29 + $0x28] sm:$0xff]  ;;  %v88_v35 = vld [vmem:[%s4408_s29 + $0xb0] sm:$0xff] }
  0x11   :  { %v118_v29 = vld [vmem:[%s4408_s29 + $0x1a0] sm:$0xff]  ;;  %3312 = vmatprep.subr.bf16.mxu1 %v3311_v21  ;;  %v119_v30 = vld [vmem:[%s4408_s29 + $0x1a8] sm:$0xff]  ;;  %v3285_v33 = vpack.c.bf16 %v71_v28, %v70_v27  ;;  %v89_v36 = vld [vmem:[%s4408_s29 + $0xb8] sm:$0xff] }
  0x12   :  { %v102_v31 = vld [vmem:[%s4408_s29 + $0x120] sm:$0xff]  ;;  %v103_v32 = vld [vmem:[%s4408_s29 + $0x128] sm:$0xff]  ;;  %3282 = vmatpush3.bf16.msra.mxu0 %v3281_v17  ;;  %v3315_v34 = vpack.c.bf16 %v119_v30, %v118_v29  ;;  %v72_v37 = vld [vmem:[%s4408_s29 + $0x30] sm:$0xff]  ;;  %v3287_v39 = vpack.c.bf16 %v89_v36, %v88_v35 }
  0x13   :  { %3284 = vmatprep.subr.bf16.mxu0 %v3283_v26  ;;  %v3317_v38 = vpack.c.bf16 %v103_v32, %v102_v31  ;;  %v73_v40 = vld [vmem:[%s4408_s29 + $0x38] sm:$0xff]  ;;  %v120_v41 = vld [vmem:[%s4408_s29 + $0x1b0] sm:$0xff]  ;;  %v90_v46 = vld [vmem:[%s4408_s29 + $0xc0] sm:$0xff] }
  0x14   :  { %3314 = vmatpush3.bf16.msra.mxu1 %v3313_v25  ;;  %v121_v42 = vld [vmem:[%s4408_s29 + $0x1b8] sm:$0xff]  ;;  %v104_v44 = vld [vmem:[%s4408_s29 + $0x130] sm:$0xff]  ;;  %v91_v47 = vld [vmem:[%s4408_s29 + $0xc8] sm:$0xff]  ;;  %v3289_v48 = vpack.c.bf16 %v73_v40, %v72_v37 }
  0x15   :  { %3316 = vmatprep.subr.bf16.mxu1 %v3315_v34  ;;  %v3319_v43 = vpack.c.bf16 %v121_v42, %v120_v41  ;;  %v105_v45 = vld [vmem:[%s4408_s29 + $0x138] sm:$0xff]  ;;  %v122_v49 = vld [vmem:[%s4408_s29 + $0x1c0] sm:$0xff]  ;;  %v123_v50 = vld [vmem:[%s4408_s29 + $0x1c8] sm:$0xff]  ;;  %v3291_v52 = vpack.c.bf16 %v91_v47, %v90_v46 }
  0x16   :  { %3286 = vmatpush3.bf16.msra.mxu0 %v3285_v33  ;;  %v3321_v51 = vpack.c.bf16 %v105_v45, %v104_v44  ;;  %v74_v53 = vld [vmem:[%s4408_s29 + $0x40] sm:$0xff]  ;;  %v75_v54 = vld [vmem:[%s4408_s29 + $0x48] sm:$0xff]  ;;  %v3323_v56 = vpack.c.bf16 %v123_v50, %v122_v49  ;;  %v92_v58 = vld [vmem:[%s4408_s29 + $0xd0] sm:$0xff] }
  0x17   :  { %3288 = vmatprep.subr.bf16.mxu0 %v3287_v39  ;;  %v106_v55 = vld [vmem:[%s4408_s29 + $0x140] sm:$0xff]  ;;  %v107_v57 = vld [vmem:[%s4408_s29 + $0x148] sm:$0xff]  ;;  %v93_v59 = vld [vmem:[%s4408_s29 + $0xd8] sm:$0xff]  ;;  %v3293_v62 = vpack.c.bf16 %v75_v54, %v74_v53 }
  0x18   :  { %3318 = vmatpush3.bf16.msra.mxu1 %v3317_v38  ;;  %v124_v60 = vld [vmem:[%s4408_s29 + $0x1d0] sm:$0xff]  ;;  %v125_v61 = vld [vmem:[%s4408_s29 + $0x1d8] sm:$0xff]  ;;  %v3325_v63 = vpack.c.bf16 %v107_v57, %v106_v55  ;;  %v3295_v0 = vpack.c.bf16 %v93_v59, %v92_v58  ;;  %v94_v6 = vld [vmem:[%s4408_s29 + $0xe0] sm:$0xff] }
  0x19   :  { %3320 = vmatprep.subr.bf16.mxu1 %v3319_v43  ;;  %v76_v1 = vld [vmem:[%s4408_s29 + $0x50] sm:$0xff]  ;;  %v77_v2 = vld [vmem:[%s4408_s29 + $0x58] sm:$0xff]  ;;  %v3327_v4 = vpack.c.bf16 %v125_v61, %v124_v60  ;;  %v95_v7 = vld [vmem:[%s4408_s29 + $0xe8] sm:$0xff] }
  0x1a   :  { %3290 = vmatpush3.bf16.msra.mxu0 %v3289_v48  ;;  %v108_v3 = vld [vmem:[%s4408_s29 + $0x150] sm:$0xff]  ;;  %v109_v5 = vld [vmem:[%s4408_s29 + $0x158] sm:$0xff]  ;;  %v126_v8 = vld [vmem:[%s4408_s29 + $0x1e0] sm:$0xff]  ;;  %v3297_v10 = vpack.c.bf16 %v77_v2, %v76_v1  ;;  %v3299_v14 = vpack.c.bf16 %v95_v7, %v94_v6 }
  0x1b   :  { %3292 = vmatprep.subr.bf16.mxu0 %v3291_v52  ;;  %v127_v9 = vld [vmem:[%s4408_s29 + $0x1e8] sm:$0xff]  ;;  %v78_v11 = vld [vmem:[%s4408_s29 + $0x60] sm:$0xff]  ;;  %v3329_v13 = vpack.c.bf16 %v109_v5, %v108_v3  ;;  %v96_v19 = vld [vmem:[%s4408_s29 + $0xf0] sm:$0xff] }
  0x1c   :  { %3322 = vmatpush3.bf16.msra.mxu1 %v3321_v51  ;;  %v61_v12 = vld [vmem:[%s4409_s23 + $0x8] sm:$0xff]  ;;  %v110_v16 = vld [vmem:[%s4408_s29 + $0x160] sm:$0xff]  ;;  %v3331_v18 = vpack.c.bf16 %v127_v9, %v126_v8  ;;  %v97_v20 = vld [vmem:[%s4408_s29 + $0xf8] sm:$0xff] }
  0x1d   :  { %3324 = vmatprep.subr.bf16.mxu1 %v3323_v56  ;;  %v79_v15 = vld [vmem:[%s4408_s29 + $0x68] sm:$0xff]  ;;  %233 = vmatprep.mubr.f32.mxu0 %v61_v12  ;;  %v63_v21 = vld [vmem:[%s4409_s23 + $0x18] sm:$0xff]  ;;  %v128_v22 = vld [vmem:[%s4408_s29 + $0x1f0] sm:$0xff]  ;;  %v3303_v26 = vpack.c.bf16 %v97_v20, %v96_v19 }
  0x1e   :  { %3294 = vmatpush3.bf16.msra.mxu0 %v3293_v62  ;;  %v111_v17 = vld [vmem:[%s4408_s29 + $0x168] sm:$0xff]  ;;  %v129_v23 = vld [vmem:[%s4408_s29 + $0x1f8] sm:$0xff]  ;;  %303 = vmatprep.mubr.f32.mxu1 %v63_v21  ;;  %v3301_v24 = vpack.c.bf16 %v79_v15, %v78_v11  ;;  %v80_v27 = vld [vmem:[%s4408_s29 + $0x70] sm:$0xff] }
  0x1f   :  { %3296 = vmatprep.subr.bf16.mxu0 %v3295_v0  ;;  %v3333_v25 = vpack.c.bf16 %v111_v17, %v110_v16  ;;  %v81_v28 = vld [vmem:[%s4408_s29 + $0x78] sm:$0xff]  ;;  %v112_v29 = vld [vmem:[%s4408_s29 + $0x170] sm:$0xff]  ;;  %v3335_v30 = vpack.c.bf16 %v129_v23, %v128_v22  ;;  %v146_v32 = vld [vmem:[%s4408_s29 + $0x280] sm:$0xff] }
  0x20   :  { %3326 = vmatpush3.bf16.msra.mxu1 %v3325_v63  ;;  %v113_v31 = vld [vmem:[%s4408_s29 + $0x178] sm:$0xff]  ;;  %v147_v33 = vld [vmem:[%s4408_s29 + $0x288] sm:$0xff]  ;;  %v3305_v34 = vpack.c.bf16 %v81_v28, %v80_v27  ;;  %v130_v37 = vld [vmem:[%s4408_s29 + $0x200] sm:$0xff] }
  0x21   :  { %3328 = vmatprep.subr.bf16.mxu1 %v3327_v4  ;;  %v3337_v35 = vpack.c.bf16 %v113_v31, %v112_v29  ;;  %v3339_v36 = vpack.c.bf16 %v147_v33, %v146_v32  ;;  %v131_v38 = vld [vmem:[%s4408_s29 + $0x208] sm:$0xff]  ;;  %v148_v39 = vld [vmem:[%s4408_s29 + $0x290] sm:$0xff]  ;;  %v149_v40 = vld [vmem:[%s4408_s29 + $0x298] sm:$0xff] }
  0x22   :  { %3298 = vmatpush3.bf16.msra.mxu0 %v3297_v10  ;;  %v60_v41 = vld [vmem:[%s4409_s23] sm:$0xff]  ;;  %v3341_v42 = vpack.c.bf16 %v131_v38, %v130_v37  ;;  %v62_v43 = vld [vmem:[%s4409_s23 + $0x10] sm:$0xff]  ;;  %v3343_v44 = vpack.c.bf16 %v149_v40, %v148_v39  ;;  %v133_v46 = vld [vmem:[%s4408_s29 + $0x218] sm:$0xff] }
  0x23   :  { %3300 = vmatprep.subr.bf16.mxu0 %v3299_v14  ;;  %v132_v45 = vld [vmem:[%s4408_s29 + $0x210] sm:$0xff]  ;;  %v150_v47 = vld [vmem:[%s4408_s29 + $0x2a0] sm:$0xff]  ;;  %v151_v48 = vld [vmem:[%s4408_s29 + $0x2a8] sm:$0xff] }
  0x24   :  { %3330 = vmatpush3.bf16.msra.mxu1 %v3329_v13  ;;  %v65_v49 = vld [vmem:[%s4409_s23 + $0x28] sm:$0xff] }
  0x25   :  { %3332 = vmatprep.subr.bf16.mxu1 %v3331_v18 }
  0x26   :  { %3302 = vmatpush3.bf16.msra.mxu0 %v3301_v24 }
  0x27   :  { %3304 = vmatprep.subr.bf16.mxu0 %v3303_v26 }
  0x28   :  { %3334 = vmatpush3.bf16.msra.mxu1 %v3333_v25 }
  0x29   :  { %3336 = vmatprep.subr.bf16.mxu1 %v3335_v30 }
  0x2a   :  { %3306 = vmatpush3.bf16.msra.mxu0 %v3305_v34 }
  0x2b   :  { %3340 = vmatprep.subr.bf16.mxu0 %v3339_v36 }
  0x2c   :  { %3338 = vmatpush3.bf16.msra.mxu1 %v3337_v35 }
  0x2d   :  { %23 = vsyncpa [#allocation5], 0  ;;  %234 = vmatmul.mubr.f32.vlgmr.msra.gmra.mrb[0].mxu0 %v60_v41  ;;  %v3345_v50 = vpack.c.bf16 %v133_v46, %v132_v45  ;;  %v3347_v51 = vpack.c.bf16 %v151_v48, %v150_v47  ;;  %v134_v52 = vld [vmem:[%s4408_s29 + $0x220] sm:$0xff]  ;;  %v135_v53 = vld [vmem:[%s4408_s29 + $0x228] sm:$0xff]  ;;  %vm380_vm0 = vcmask 254976   ;;  %vm386_vm1 = vcmask 257024  }
  0x2e   :  { %3342 = vmatpush3.bf16.msra.mxu0 %v3341_v42  ;;  %373 = vmatprep.mubr.f32.mxu0 %v65_v49  ;;  %v152_v54 = vld [vmem:[%s4408_s29 + $0x2b0] sm:$0xff]  ;;  %v153_v55 = vld [vmem:[%s4408_s29 + $0x2b8] sm:$0xff]  ;;  %v3349_v56 = vpack.c.bf16 %v135_v53, %v134_v52  ;;  %v154_v60 = vld [vmem:[%s4408_s29 + $0x2c0] sm:$0xff]  ;;  %vm392_vm2 = vcmask 261124   ;;  %vm398_vm3 = vcmask 261120   ;;  %vm3545_vm4 = vmmov 0  }
  0x2f   :  { %304 = vmatmul.mubr.f32.vlgmr.msra.gmra.mrb[0].mxu1 %v62_v43  ;;  %3344 = vmatprep.subr.bf16.mxu0 %v3343_v44  ;;  %v3351_v57 = vpack.c.bf16 %v153_v55, %v152_v54  ;;  %v136_v58 = vld [vmem:[%s4408_s29 + $0x230] sm:$0xff]  ;;  %v137_v59 = vld [vmem:[%s4408_s29 + $0x238] sm:$0xff]  ;;  %v155_v61 = vld [vmem:[%s4408_s29 + $0x2c8] sm:$0xff]  ;;  %s3546_s1 = smov 96   ;;  %vm537_vm5 = vcmask 130048   ;;  %vm613_vm6 = vcmask 46080  }
  0x30   :  { %v3353_v62 = vpack.c.bf16 %v137_v59, %v136_v58  ;;  %v3355_v63 = vpack.c.bf16 %v155_v61, %v154_v60  ;;  %v138_v0 = vld [vmem:[%s4408_s29 + $0x240] sm:$0xff]  ;;  %v139_v1 = vld [vmem:[%s4408_s29 + $0x248] sm:$0xff]  ;;  %v156_v2 = vld [vmem:[%s4408_s29 + $0x2d0] sm:$0xff]  ;;  %vm631_vm7 = vcmask 1045504   ;;  %vm880_vm8 = vcmask 1041408   ;;  %s3550_s20 = smov 48  }
  0x31   :  { %v157_v3 = vld [vmem:[%s4408_s29 + $0x2d8] sm:$0xff]  ;;  %v3357_v4 = vpack.c.bf16 %v139_v1, %v138_v0  ;;  %v140_v6 = vld [vmem:[%s4408_s29 + $0x250] sm:$0xff]  ;;  %v158_v8 = vld [vmem:[%s4408_s29 + $0x2e0] sm:$0xff]  ;;  %vm627_vm9 = vcmask 48128   ;;  %vm704_vm10 = vcmask 128000   ;;  %s3551_s21 = smov 16  }
  0x32   :  { %3346 = vmatpush3.bf16.msra.mxu0 %v3345_v50  ;;  %v3359_v5 = vpack.c.bf16 %v157_v3, %v156_v2  ;;  %v141_v7 = vld [vmem:[%s4408_s29 + $0x258] sm:$0xff]  ;;  %v159_v9 = vld [vmem:[%s4408_s29 + $0x2e8] sm:$0xff]  ;;  %v142_v12 = vld [vmem:[%s4408_s29 + $0x260] sm:$0xff]  ;;  %vm877_vm11 = vcmask 259200   ;;  %vm1487_vm12 = vcmask 523264   ;;  %vm2757_vm13 = vcmask 253952  }
  0x33   :  { %3348 = vmatprep.subr.bf16.mxu0 %v3347_v51  ;;  %v3361_v10 = vpack.c.bf16 %v141_v7, %v140_v6  ;;  %v3363_v11 = vpack.c.bf16 %v159_v9, %v158_v8  ;;  %v143_v13 = vld [vmem:[%s4408_s29 + $0x268] sm:$0xff]  ;;  %v160_v14 = vld [vmem:[%s4408_s29 + $0x2f0] sm:$0xff]  ;;  %v161_v15 = vld [vmem:[%s4408_s29 + $0x2f8] sm:$0xff] }
  0x34   :  { %v3365_v16 = vpack.c.bf16 %v143_v13, %v142_v12  ;;  %v3367_v17 = vpack.c.bf16 %v161_v15, %v160_v14  ;;  %v144_v18 = vld [vmem:[%s4408_s29 + $0x270] sm:$0xff]  ;;  %v145_v19 = vld [vmem:[%s4408_s29 + $0x278] sm:$0xff]  ;;  %v64_v21 = vld [vmem:[%s4409_s23 + $0x20] sm:$0xff]  ;;  %s4410_s29 = sld [smem:[#allocation9_spill]]  ;;  %v3544_v12 = vmov 0.0   ;;  %s3549_s23 = smov 112  }
  0x35   :  { %v3369_v20 = vpack.c.bf16 %v145_v19, %v144_v18  ;;  %v379_v22 = vld [vmem:[%s4387_s3] sm:$0x3f]  ;;  %v443_v55 = vld [vmem:[%s4390_s6 + $0x8] sm:$0xff]  ;;  %v445_v58 = vld [vmem:[%s4390_s6 + $0x18] sm:$0xff]  ;;  %s3548_s3 = smov 64  }
  0x36   :  { %3350 = vmatpush3.bf16.msra.mxu0 %v3349_v56  ;;  %381 = vst.msk [vmem:[#allocation2] sm:$0x3] %vm380_vm0, %v379_v22  ;;  %388 = vst.msk [vmem:[#allocation2 + $0x6] sm:$0x3] %vm380_vm0, %v379_v22  ;;  %v383_v35 = vrot.slane %v379_v22, 2  ;;  %v389_v36 = vrot.slane %v379_v22, 6 }
  0x37   :  { %3352 = vmatprep.subr.bf16.mxu0 %v3351_v57  ;;  %v442_v54 = vld [vmem:[%s4390_s6] sm:$0xff]  ;;  %v444_v57 = vld [vmem:[%s4390_s6 + $0x10] sm:$0xff] }
  0x38   :  { %v3371_v56 = vpack.c.bf16 %v443_v55, %v442_v54  ;;  %v3375_v59 = vpack.c.bf16 %v445_v58, %v444_v57  ;;  %v2806_v3 = vld [vmem:[%s4388_s4] ss:$0 sm:$0xff] }
  0x39   :  { %v2808_v13 = vld [vmem:[%s4391_s7] ss:$0 sm:$0xff] }
  0x3a   :  { %3354 = vmatpush3.bf16.msra.mxu0 %v3353_v62  ;;  %v2805_v24 = vld [vmem:[%s4410_s29] ss:$0 sm:$0xff]  ;;  %3372 = vmatprep.subr.bf16.mxu1 %v3371_v56  ;;  %s3547_s29 = smov 80  }
  0x3b   :  { %3356 = vmatprep.subr.bf16.mxu0 %v3355_v63  ;;  %3374 = vmatpush3.bf16.msra.mxu1 %v3371_v56 }
  0x3c   :  { %3376 = vmatprep.subr.bf16.mxu1 %v3375_v59 }
  0x3e   :  { %3358 = vmatpush3.bf16.msra.mxu0 %v3357_v4 }
  0x3f   :  { %3360 = vmatprep.subr.bf16.mxu0 %v3359_v5  ;;  %3378 = vmatpush3.bf16.msra.mxu1 %v3375_v59  ;;  %v2807_v5 = vld [vmem:[%s4389_s5] ss:$0 sm:$0xff] }
  0x40   :  { %3102 = vmatprep.subr.mxu1 %v3544_v12 }
  0x42   :  { %3362 = vmatpush3.bf16.msra.mxu0 %v3361_v10 }
  0x43   :  { %3364 = vmatprep.subr.bf16.mxu0 %v3363_v11 }
  0x46   :  { %3366 = vmatpush3.bf16.msra.mxu0 %v3365_v16 }
  0x47   :  { %3368 = vmatprep.subr.bf16.mxu0 %v3367_v17 }
  0x4a   :  { %3370 = vmatpush3.bf16.msra.mxu0 %v3369_v20 }
  0x4b   :  { %3132 = vmatprep.subr.mxu0 %v3544_v12 }
  0x4d   :  { %374 = vmatmul.mubr.f32.vlgmr.msra.gmra.mrb[2].mxu0 %v64_v21 }
  0x4e   :  { %3134 = vmatprep.mubr.msk.f32.mxu0 %vm3545_vm4, %v3544_v12 }
 0x100   :  { %v2930_v23 = vpop.f32.mrb[0].mxu0 }
 0x101   :  { %v2931_v25 = vpop.f32.mrb[1].mxu0 }
 0x102   :  { %v2965_v26 = vpop.f32.mrb[0].mxu1  ;;  %v2932_v27 = vadd.f32 %v2931_v25, %v2930_v23 }
 0x103   :  { %v2966_v28 = vpop.f32.mrb[1].mxu1 }
 0x104   :  { %v2967_v29 = vadd.f32 %v2966_v28, %v2965_v26  ;;  %v236_v30 = vadd.f32 %v2932_v27, %v2805_v24 }
 0x106   :  { %v306_v31 = vadd.f32 %v2967_v29, %v236_v30 }
 0x120   :  { %v3000_v32 = vpop.f32.mrb[2].mxu0 }
 0x121   :  { %v3001_v33 = vpop.f32.mrb[3].mxu0 }
 0x122   :  { %v3002_v34 = vadd.f32 %v3001_v33, %v3000_v32 }
 0x124   :  { %v376_v37 = vadd.f32 %v3002_v34, %v306_v31 }
 0x126   :  { %v385_v38 = vadd.f32 %v383_v35, %v376_v37  ;;  %v391_v39 = vadd.f32 %v389_v36, %v376_v37 }
 0x128   :  { %387 = vst.msk [vmem:[#allocation2 + $0x2] sm:$0xf] %vm386_vm1, %v385_v38 }
 0x129   :  { %393 = vst.msk [vmem:[#allocation2 + $0x4] sm:$0xf0] %vm392_vm2, %v391_v39 }
 0x12f   :  { %v3961_v40 = vld [vmem:[#allocation2] sm:$0xff] }
 0x130   :  { %v399_v41 = vsel %vm398_vm3, %v3961_v40, 0.0  ;;  %v3965_v42 = vld [vmem:[#allocation2 + $0x8] sm:$0xf] }
 0x131   :  { %400 = vadd.xlane.f32.xlu0 %v399_v41  ;;  %v402_v43 = vsel %vm386_vm1, %v3965_v42, 0.0 }
 0x135   :  { %403 = vadd.xlane.f32.xlu0 %v402_v43 }
 0x1be   :  { %v401_v44 = vpop.xlane.xlu0 %400 }
 0x1bf   :  { %v406_v45 = vmul.f32 0.03125, %v401_v44 }
 0x1c1   :  { %v408_v46 = vsub.f32 %v3961_v40, %v406_v45 }
 0x1c2   :  { %v404_v47 = vpop.xlane.xlu0 %403 }
 0x1c3   :  { %v407_v48 = vmul.f32 0.03125, %v404_v47  ;;  %v410_v49 = vmul.f32 %v408_v46, %v408_v46 }
 0x1c5   :  { %v409_v50 = vsub.f32 %v3965_v42, %v407_v48  ;;  %v412_v51 = vsel %vm398_vm3, %v410_v49, 0.0 }
 0x1c6   :  { %413 = vadd.xlane.f32.xlu1 %v412_v51 }
 0x1c7   :  { %v411_v52 = vmul.f32 %v409_v50, %v409_v50 }
 0x1c9   :  { %v415_v53 = vsel %vm386_vm1, %v411_v52, 0.0 }
 0x1ca   :  { %416 = vadd.xlane.f32.xlu1 %v415_v53 }
 0x253   :  { %v414_v60 = vpop.xlane.xlu1 %413 }
 0x254   :  { %v418_v61 = vmul.f32 0.03125, %v414_v60 }
 0x256   :  { %v420_v62 = vadd.f32 1e-12, %v418_v61 }
 0x257   :  { %v417_v63 = vpop.xlane.xlu1 %416 }
 0x258   :  { %3460 = vrsqrt.f32 %v420_v62  ;;  %v419_v0 = vmul.f32 0.03125, %v417_v63 }
 0x25a   :  { %v421_v1 = vadd.f32 1e-12, %v419_v0 }
 0x25c   :  { %3462 = vrsqrt.f32 %v421_v1 }
 0x262   :  { %v3461_v2 = vpop.eup %3460 }
 0x263   :  { %v424_v4 = vmul.f32 %v3461_v2, %v408_v46 }
 0x265   :  { %v432_v6 = vmul.f32 %v2806_v3, %v424_v4 }
 0x266   :  { %v3463_v7 = vpop.eup %3462 }
 0x267   :  { %v425_v8 = vmul.f32 %v3463_v7, %v409_v50  ;;  %v440_v9 = vadd.f32 %v2807_v5, %v432_v6 }
 0x269   :  { %v433_v10 = vmul.f32 %v2806_v3, %v425_v8  ;;  %3099 = vmatprep.mubr.msk.f32.mxu1 %vm398_vm3, %v440_v9 }
 0x26b   :  { %v441_v11 = vadd.f32 %v2807_v5, %v433_v10 }
 0x26d   :  { %3100 = vmatmul.mubr.msk.f32.vlgmr.msra.gmra.mrb[2].mxu1 %vm398_vm3, %v441_v11 }
 0x26e   :  { %3104 = vmatprep.mubr.msk.f32.mxu1 %vm3545_vm4, %v3544_v12 }
 0x340   :  { %v3101_v14 = vpop.f32.mrb[2].mxu1 }
 0x341   :  { %v531_v15 = vadd.f32 %v3101_v14, %v2808_v13  ;;  %v525_v16 = vpop.f32.mrb[3].mxu1 }
 0x342   :  { %v526_v17 = vadd.f32 %v2808_v13, %v525_v16 }
 0x343   :  { %v882_v29 = vrot.slane %v531_v15, 6 }
 0x344   :  { %535 = vrot.lane.b32.xlu0 %v526_v17, %s3546_s1  ;;  %v881_v30 = vrot.slane %v526_v17, 6 }
 0x346   :  { %v4016_v31 = vsel %vm880_vm8, %v881_v30, %v882_v29 }
 0x348   :  { %708 = vrot.lane.b32.xlu0 %v526_v17, %s3547_s29 }
 0x3b6   :  { %v536_v18 = vpop.permute.xlu0 %535 }
 0x3b7   :  { %3103 = vmatpush3.xpose.msk.msra.mxu1 %vm537_vm5, %v536_v18 }
 0x3b8   :  { %3107 = vmatprep.subr.mxu1 %v3544_v12 }
 0x3ba   :  { %3105 = vmatmul.mubr.msk.f32.vlgmr.msra.gmra.mrb[4].mxu1 %vm537_vm5, %v526_v17  ;;  %v709_v35 = vpop.permute.xlu0 %708 }
 0x3bb   :  { %3109 = vmatprep.mubr.msk.f32.mxu1 %vm3545_vm4, %v3544_v12 }
 0x48d   :  { %v608_v19 = vpop.f32.mrb[4].mxu1 }
 0x48e   :  { %v612_v20 = vmul.f32 0.25, %v608_v19  ;;  %v3106_v21 = vpop.f32.mrb[5].mxu1 }
 0x490   :  { %v614_v22 = vsel %vm613_vm6, %v612_v20, -inf }
 0x491   :  { %615 = vmax.xlane.f32.xlu1 %v614_v22 }
 0x4a2   :  { %625 = vrot.lane.b32.xlu1 %v526_v17, %s3548_s3 }
 0x51e   :  { %v616_v23 = vpop.xlane.xlu1 %615 }
 0x51f   :  { %v617_v24 = vsub.f32 %v612_v20, %v616_v23  ;;  %v1224_v23 = vld [vmem:[%s4392_s8] sm:$0xff] }
 0x521   :  { %v618_v25 = vmul.f32 1.442695, %v617_v24  ;;  %v1225_v24 = vld [vmem:[%s4392_s8 + $0x8] sm:$0xff] }
 0x522   :  { %v626_v26 = vpop.permute.xlu1 %625 }
 0x523   :  { %3464 = vpow2.f32 %v618_v25  ;;  %3108 = vmatpush3.msk.msra.mxu1 %vm631_vm7, %v626_v26  ;;  %v3379_v25 = vpack.c.bf16 %v1225_v24, %v1224_v23  ;;  %v1226_v26 = vld [vmem:[%s4392_s8 + $0x10] sm:$0xff]  ;;  %v1479_v24 = vld [vmem:[%s4398_s14 + $0x38] sm:$0xff] }
 0x524   :  { %3112 = vmatprep.subr.mxu1 %v3544_v12  ;;  %v1478_v23 = vld [vmem:[%s4398_s14 + $0x30] sm:$0xff] }
 0x52d   :  { %v3465_v27 = vpop.eup %3464 }
 0x52e   :  { %v620_v28 = vsel %vm613_vm6, %v3465_v27, 0.0 }
 0x52f   :  { %621 = vadd.xlane.f32.xlu1 %v620_v28 }
 0x540   :  { %706 = vrot.lane.b32.xlu1 %v526_v17, %s3549_s23 }
 0x544   :  { %884 = vrot.lane.b32.xlu1 %v4016_v31, %s3546_s1 }
 0x5bc   :  { %v622_v32 = vpop.xlane.xlu1 %621 }
 0x5bd   :  { %3466 = vrcp.f32 %v622_v32 }
 0x5c0   :  { %v707_v36 = vpop.permute.xlu1 %706 }
 0x5c4   :  { %v885_v52 = vpop.permute.xlu1 %884 }
 0x5c7   :  { %v3467_v33 = vpop.eup %3466 }
 0x5c8   :  { %v624_v34 = vmul.f32 %v3467_v33, %v3465_v27  ;;  %v1227_v27 = vld [vmem:[%s4392_s8 + $0x18] sm:$0xff] }
 0x5c9   :  { %v3383_v28 = vpack.c.bf16 %v1227_v27, %v1226_v26  ;;  %v2832_v26 = vld [vmem:[%s4397_s13] ss:$0 sm:$0xff] }
 0x5ca   :  { %3110 = vmatmul.mubr.msk.f32.vlgmr.msra.gmra.mrb[6].mxu1 %vm627_vm9, %v624_v34 }
 0x5cb   :  { %3113 = vmatpush3.xpose.msk.msra.mxu1 %vm537_vm5, %v709_v35  ;;  %3114 = vmatprep.mubr.msk.f32.mxu1 %vm3545_vm4, %v3544_v12 }
 0x5cc   :  { %3117 = vmatprep.subr.mxu1 %v3544_v12 }
 0x5ce   :  { %3115 = vmatmul.mubr.msk.f32.vlgmr.msra.gmra.mrb[8].mxu1 %vm537_vm5, %v707_v36  ;;  %v2827_v36 = vld [vmem:[%s4393_s9] ss:$0 sm:$0xff] }
 0x5cf   :  { %3119 = vmatprep.mubr.msk.f32.mxu1 %vm3545_vm4, %v3544_v12 }
 0x69d   :  { %v700_v37 = vpop.f32.mrb[6].mxu1 }
 0x69e   :  { %705 = vst.msk [vmem:[#allocation3] sm:$0x3f] %vm704_vm10, %v700_v37  ;;  %v3111_v38 = vpop.f32.mrb[7].mxu1 }
 0x6a1   :  { %v780_v39 = vpop.f32.mrb[8].mxu1 }
 0x6a2   :  { %v784_v41 = vmul.f32 0.25, %v780_v39  ;;  %v3116_v43 = vpop.f32.mrb[9].mxu1 }
 0x6a4   :  { %v785_v44 = vsel %vm613_vm6, %v784_v41, -inf }
 0x6a5   :  { %786 = vmax.xlane.f32.xlu0 %v785_v44 }
 0x6bb   :  { %796 = vrot.lane.b32.xlu0 %v526_v17, %s3550_s20 }
 0x6bf   :  { %1052 = vrot.lane.b32.xlu0 %v4016_v31, %s3547_s29 }
 0x732   :  { %v787_v45 = vpop.xlane.xlu0 %786 }
 0x733   :  { %v788_v46 = vsub.f32 %v784_v41, %v787_v45 }
 0x735   :  { %v789_v47 = vmul.f32 1.442695, %v788_v46 }
 0x736   :  { %v797_v48 = vpop.permute.xlu0 %796 }
 0x737   :  { %3468 = vpow2.f32 %v789_v47  ;;  %3118 = vmatpush3.msk.msra.mxu1 %vm631_vm7, %v797_v48 }
 0x738   :  { %3122 = vmatprep.subr.mxu1 %v3544_v12 }
 0x73a   :  { %v1053_v49 = vpop.permute.xlu0 %1052 }
 0x73b   :  { %3133 = vmatpush3.xpose.msk.msra.mxu0 %vm537_vm5, %v1053_v49 }
 0x741   :  { %v3469_v50 = vpop.eup %3468 }
 0x742   :  { %v791_v51 = vsel %vm613_vm6, %v3469_v50, 0.0 }
 0x743   :  { %792 = vadd.xlane.f32.xlu1 %v791_v51 }
 0x754   :  { %1050 = vrot.lane.b32.xlu1 %v4016_v31, %s3549_s23 }
 0x7d0   :  { %v793_v53 = vpop.xlane.xlu1 %792 }
 0x7d1   :  { %3470 = vrcp.f32 %v793_v53 }
 0x7d4   :  { %v1051_v54 = vpop.permute.xlu1 %1050 }
 0x7d5   :  { %3135 = vmatmul.mubr.msk.f32.vlgmr.msra.gmra.mrb[4].mxu0 %vm537_vm5, %v1051_v54 }
 0x7db   :  { %v3471_v55 = vpop.eup %3470 }
 0x7dc   :  { %v795_v56 = vmul.f32 %v3471_v55, %v3469_v50  ;;  %v1362_v55 = vld [vmem:[%s4396_s12] sm:$0xff] }
 0x7de   :  { %3120 = vmatmul.mubr.msk.f32.vlgmr.msra.gmra.mrb[10].mxu1 %vm627_vm9, %v795_v56  ;;  %v1363_v56 = vld [vmem:[%s4396_s12 + $0x8] sm:$0xff] }
 0x7df   :  { %3123 = vmatpush3.xpose.msk.msra.mxu1 %vm537_vm5, %v885_v52  ;;  %3124 = vmatprep.mubr.msk.f32.mxu1 %vm3545_vm4, %v3544_v12 }
 0x7e0   :  { %3127 = vmatprep.subr.mxu1 %v3544_v12 }
 0x7e2   :  { %3125 = vmatmul.mubr.msk.f32.vlgmr.msra.gmra.mrb[12].mxu1 %vm537_vm5, %v4016_v31 }
 0x7e3   :  { %3129 = vmatprep.mubr.msk.f32.mxu1 %vm3545_vm4, %v3544_v12 }
 0x8a8   :  { %v1124_v57 = vpop.f32.mrb[4].mxu0 }
 0x8a9   :  { %v1128_v58 = vmul.f32 0.25, %v1124_v57  ;;  %v3136_v59 = vpop.f32.mrb[5].mxu0  ;;  %v3387_v57 = vpack.c.bf16 %v1363_v56, %v1362_v55 }
 0x8aa   :  { %v1365_v59 = vld [vmem:[%s4396_s12 + $0x18] sm:$0xff] }
 0x8ab   :  { %v1129_v60 = vsel %vm613_vm6, %v1128_v58, -inf }
 0x8ac   :  { %1130 = vmax.xlane.f32.xlu1 %v1129_v60 }
 0x8b1   :  { %v869_v61 = vpop.f32.mrb[10].mxu1 }
 0x8b2   :  { %v3121_v62 = vpop.f32.mrb[11].mxu1 }
 0x8b5   :  { %v956_v63 = vpop.f32.mrb[12].mxu1 }
 0x8b6   :  { %v960_v0 = vmul.f32 0.25, %v956_v63  ;;  %v3126_v1 = vpop.f32.mrb[13].mxu1 }
 0x8b8   :  { %v961_v2 = vsel %vm613_vm6, %v960_v0, -inf }
 0x8b9   :  { %962 = vmax.xlane.f32.xlu0 %v961_v2 }
 0x8bd   :  { %1140 = vrot.lane.b32.xlu1 %v4016_v31, %s3550_s20 }
 0x8c1   :  { %874 = vrot.lane.b32.xlu1 %v869_v61, %s3551_s21 }
 0x939   :  { %v1131_v3 = vpop.xlane.xlu1 %1130 }
 0x93a   :  { %v1132_v4 = vsub.f32 %v1128_v58, %v1131_v3  ;;  %v1364_v58 = vld [vmem:[%s4396_s12 + $0x10] sm:$0xff] }
 0x93b   :  { %v3391_v60 = vpack.c.bf16 %v1365_v59, %v1364_v58 }
 0x93c   :  { %v1133_v5 = vmul.f32 1.442695, %v1132_v4  ;;  %v2830_v4 = vld [vmem:[%s4394_s10] ss:$0 sm:$0xff] }
 0x93d   :  { %v1141_v6 = vpop.permute.xlu1 %1140 }
 0x93e   :  { %3472 = vpow2.f32 %v1133_v5 }
 0x941   :  { %v875_v7 = vpop.permute.xlu1 %874 }
 0x942   :  { %878 = vst.msk [vmem:[#allocation3] sm:$0x3f] %vm877_vm11, %v875_v7 }
 0x946   :  { %v963_v8 = vpop.xlane.xlu0 %962 }
 0x947   :  { %v964_v9 = vsub.f32 %v960_v0, %v963_v8 }
 0x948   :  { %v3473_v10 = vpop.eup %3472 }
 0x949   :  { %v965_v11 = vmul.f32 1.442695, %v964_v9  ;;  %v1135_v13 = vsel %vm613_vm6, %v3473_v10, 0.0 }
 0x94a   :  { %1136 = vadd.xlane.f32.xlu0 %v1135_v13 }
 0x94b   :  { %3474 = vpow2.f32 %v965_v11 }
 0x955   :  { %v3475_v14 = vpop.eup %3474 }
 0x956   :  { %v967_v15 = vsel %vm613_vm6, %v3475_v14, 0.0 }
 0x957   :  { %968 = vadd.xlane.f32.xlu0 %v967_v15  ;;  %v1473_v15 = vld [vmem:[%s4398_s14 + $0x8] sm:$0xff] }
 0x96d   :  { %972 = vrot.lane.b32.xlu0 %v4016_v31, %s3548_s3 }
 0x9d7   :  { %v1137_v16 = vpop.xlane.xlu0 %1136 }
 0x9e4   :  { %v969_v17 = vpop.xlane.xlu0 %968 }
 0x9e5   :  { %3476 = vrcp.f32 %v969_v17  ;;  %v1474_v17 = vld [vmem:[%s4398_s14 + $0x10] sm:$0xff] }
 0x9e6   :  { %3478 = vrcp.f32 %v1137_v16 }
 0x9e8   :  { %v973_v18 = vpop.permute.xlu0 %972 }
 0x9e9   :  { %3128 = vmatpush3.msk.msra.mxu1 %vm631_vm7, %v973_v18  ;;  %v1475_v18 = vld [vmem:[%s4398_s14 + $0x18] sm:$0xff] }
 0x9ea   :  { %3137 = vmatprep.subr.mxu1 %v3544_v12 }
 0x9ef   :  { %v3477_v19 = vpop.eup %3476 }
 0x9f0   :  { %v971_v20 = vmul.f32 %v3477_v19, %v3475_v14  ;;  %v3479_v21 = vpop.eup %3478  ;;  %v1472_v14 = vld [vmem:[%s4398_s14] sm:$0xff]  ;;  %v3399_v19 = vpack.c.bf16 %v1475_v18, %v1474_v17 }
 0x9f1   :  { %v1139_v22 = vmul.f32 %v3479_v21, %v3473_v10  ;;  %v3395_v16 = vpack.c.bf16 %v1473_v15, %v1472_v14  ;;  %v1477_v21 = vld [vmem:[%s4398_s14 + $0x28] sm:$0xff] }
 0x9f2   :  { %3130 = vmatmul.mubr.msk.f32.vlgmr.msra.gmra.mrb[14].mxu1 %vm627_vm9, %v971_v20  ;;  %v1476_v20 = vld [vmem:[%s4398_s14 + $0x20] sm:$0xff] }
 0x9f3   :  { %3138 = vmatpush3.msk.msra.mxu1 %vm631_vm7, %v1141_v6  ;;  %3139 = vmatprep.mubr.msk.f32.mxu1 %vm3545_vm4, %v3544_v12  ;;  %v2831_v6 = vld [vmem:[%s4395_s11] ss:$0 sm:$0xff] }
 0x9f4   :  { %3380 = vmatprep.subr.bf16.mxu1 %v3379_v25  ;;  %3396 = vmatprep.subr.bf16.mxu0 %v3395_v16 }
 0x9f5   :  { %3398 = vmatpush3.bf16.msra.mxu0 %v3395_v16 }
 0x9f6   :  { %3140 = vmatmul.mubr.msk.f32.vlgmr.msra.gmra.mrb[16].mxu1 %vm627_vm9, %v1139_v22  ;;  %3400 = vmatprep.subr.bf16.mxu0 %v3399_v19  ;;  %v3403_v22 = vpack.c.bf16 %v1477_v21, %v1476_v20  ;;  %v2840_v20 = vld [vmem:[%s4388_s4 + $0x1] ss:$0 sm:$0xff] }
 0x9f7   :  { %3382 = vmatpush3.bf16.msra.mxu1 %v3379_v25  ;;  %v3407_v25 = vpack.c.bf16 %v1479_v24, %v1478_v23  ;;  %v2841_v24 = vld [vmem:[%s4389_s5 + $0x1] ss:$0 sm:$0xff] }
 0x9f8   :  { %3384 = vmatprep.subr.bf16.mxu1 %v3383_v28 }
 0x9f9   :  { %3402 = vmatpush3.bf16.msra.mxu0 %v3399_v19 }
 0x9fa   :  { %3404 = vmatprep.subr.bf16.mxu0 %v3403_v22 }
 0x9fb   :  { %3386 = vmatpush3.bf16.msra.mxu1 %v3383_v28 }
 0x9fc   :  { %3388 = vmatprep.subr.bf16.mxu1 %v3387_v57 }
 0x9fd   :  { %3406 = vmatpush3.bf16.msra.mxu0 %v3403_v22 }
 0x9fe   :  { %3408 = vmatprep.subr.bf16.mxu0 %v3407_v25 }
 0xa01   :  { %3410 = vmatpush3.bf16.msra.mxu0 %v3407_v25 }
 0xa02   :  { %3204 = vmatprep.subr.mxu0 %v3544_v12 }
 0xac5   :  { %v1045_v29 = vpop.f32.mrb[14].mxu1 }
 0xac6   :  { %1049 = vst.msk [vmem:[#allocation3 + $0x6] sm:$0x3f] %vm704_vm10, %v1045_v29  ;;  %v3131_v30 = vpop.f32.mrb[15].mxu1 }
 0xac9   :  { %v1213_v31 = vpop.f32.mrb[16].mxu1 }
 0xaca   :  { %1218 = vrot.lane.b32.xlu1 %v1213_v31, %s3551_s21  ;;  %v3141_v32 = vpop.f32.mrb[17].mxu1 }
 0xb3c   :  { %v1219_v33 = vpop.permute.xlu1 %1218 }
 0xb3d   :  { %1221 = vst.msk [vmem:[#allocation3 + $0x6] sm:$0x3f] %vm877_vm11, %v1219_v33 }
 0xb44   :  { %v1222_v34 = vld [vmem:[#allocation3] sm:$0xff]  ;;  %v1223_v35 = vld [vmem:[#allocation3 + $0x8] sm:$0xf] }
 0xb45   :  { %3150 = vmatprep.mubr.msk.f32.mxu1 %vm398_vm3, %v1222_v34 }
 0xb46   :  { %3151 = vmatmul.mubr.msk.f32.vlgmr.msra.gmra.mrb[18].mxu1 %vm398_vm3, %v1223_v35 }
 0xb47   :  { %3390 = vmatpush3.bf16.msra.mxu1 %v3387_v57 }
 0xb48   :  { %3392 = vmatprep.subr.bf16.mxu1 %v3391_v60 }
 0xb4b   :  { %3394 = vmatpush3.bf16.msra.mxu1 %v3391_v60 }
 0xc19   :  { %v3152_v37 = vpop.f32.mrb[18].mxu1 }
 0xc1a   :  { %v1313_v38 = vadd.f32 %v3152_v37, %v2827_v36  ;;  %v1307_v39 = vpop.f32.mrb[19].mxu1 }
 0xc1b   :  { %v1308_v41 = vadd.f32 %v2827_v36, %v1307_v39 }
 0xc1c   :  { %v4087_v43 = vadd.f32 %v1313_v38, %v3965_v42 }
 0xc1d   :  { %v4090_v44 = vadd.f32 %v1308_v41, %v3961_v40 }
 0xc1e   :  { %v1323_v45 = vsel %vm386_vm1, %v4087_v43, 0.0 }
 0xc1f   :  { %1324 = vadd.xlane.f32.xlu1 %v1323_v45  ;;  %v1320_v46 = vsel %vm398_vm3, %v4090_v44, 0.0 }
 0xc20   :  { %1321 = vadd.xlane.f32.xlu0 %v1320_v46 }
 0xcac   :  { %v1325_v47 = vpop.xlane.xlu1 %1324 }
 0xcad   :  { %v1327_v48 = vmul.f32 0.03125, %v1325_v47  ;;  %v1322_v49 = vpop.xlane.xlu0 %1321 }
 0xcae   :  { %v1326_v50 = vmul.f32 0.03125, %v1322_v49 }
 0xcaf   :  { %v1329_v51 = vsub.f32 %v4087_v43, %v1327_v48 }
 0xcb0   :  { %v1328_v42 = vsub.f32 %v4090_v44, %v1326_v50 }
 0xcb1   :  { %v1331_v53 = vmul.f32 %v1329_v51, %v1329_v51 }
 0xcb2   :  { %v1330_v52 = vmul.f32 %v1328_v42, %v1328_v42 }
 0xcb3   :  { %v1335_v54 = vsel %vm386_vm1, %v1331_v53, 0.0 }
 0xcb4   :  { %v1332_v40 = vsel %vm398_vm3, %v1330_v52, 0.0  ;;  %v2835_v52 = vld [vmem:[%s4399_s15] ss:$0 sm:$0xff] }
 0xcb5   :  { %1333 = vadd.xlane.f32.xlu0 %v1332_v40 }
 0xcb9   :  { %1336 = vadd.xlane.f32.xlu0 %v1335_v54 }
 0xd42   :  { %v1334_v61 = vpop.xlane.xlu0 %1333 }
 0xd43   :  { %v1338_v62 = vmul.f32 0.03125, %v1334_v61 }
 0xd45   :  { %v1340_v63 = vadd.f32 1e-12, %v1338_v62 }
 0xd46   :  { %v1337_v0 = vpop.xlane.xlu0 %1336 }
 0xd47   :  { %3480 = vrsqrt.f32 %v1340_v63  ;;  %v1339_v1 = vmul.f32 0.03125, %v1337_v0 }
 0xd49   :  { %v1341_v2 = vadd.f32 1e-12, %v1339_v1 }
 0xd4b   :  { %3482 = vrsqrt.f32 %v1341_v2 }
 0xd51   :  { %v3481_v3 = vpop.eup %3480 }
 0xd52   :  { %v1344_v5 = vmul.f32 %v3481_v3, %v1328_v42 }
 0xd54   :  { %v1352_v7 = vmul.f32 %v2830_v4, %v1344_v5 }
 0xd55   :  { %v3483_v8 = vpop.eup %3482 }
 0xd56   :  { %v1345_v9 = vmul.f32 %v3483_v8, %v1329_v51  ;;  %v1360_v10 = vadd.f32 %v2831_v6, %v1352_v7  ;;  %v2843_v7 = vld [vmem:[%s4390_s6 + $0x28] sm:$0xff] }
 0xd58   :  { %v1353_v11 = vmul.f32 %v2830_v4, %v1345_v9  ;;  %3161 = vmatprep.mubr.msk.f32.mxu1 %vm398_vm3, %v1360_v10  ;;  %v2844_v9 = vld [vmem:[%s4390_s6 + $0x30] sm:$0xff]  ;;  %v2845_v10 = vld [vmem:[%s4390_s6 + $0x38] sm:$0xff] }
 0xd5a   :  { %v1361_v13 = vadd.f32 %v2831_v6, %v1353_v11  ;;  %v2842_v6 = vld [vmem:[%s4390_s6 + $0x20] sm:$0xff]  ;;  %v3415_v11 = vpack.c.bf16 %v2845_v10, %v2844_v9  ;;  %s3552_s6 = smov [#allocation4]  }
 0xd5b   :  { %v3411_v8 = vpack.c.bf16 %v2843_v7, %v2842_v6  ;;  %s2797_s24 = sshll.u32 %s3552_s6, 4  ;;  %s2798_s24 = int_to_ptr.vmem [resolvable:$true] %s2797_s24 }
 0xd5c   :  { %3162 = vmatmul.mubr.msk.f32.vlgmr.msra.gmra.mrb[20].mxu1 %vm398_vm3, %v1361_v13  ;;  %s3520_s25 = scalar_lea.vmem %s2798_s24, 32  ;;  %p3525_p1 = scmp.lt.s32.totalorder %s2798_s24, %s2798_s24 }
 0xd5d   :  { %3412 = vmatprep.subr.bf16.mxu1 %v3411_v8  ;;  %p3521_p0 = scmp.ne.s32.totalorder %s2798_s24, %s3520_s25  ;;  %p3526_p2 = scmp.lt.s32.totalorder %s3520_s25, %s3520_s25 }
 0xd5e   :  { %3414 = vmatpush3.bf16.msra.mxu1 %v3411_v8 }
 0xd5f   :  { %3416 = vmatprep.subr.bf16.mxu1 %v3415_v11  ;;  %p3527_p3 = por %p3526_p2, %p3525_p1 }
 0xd61   :  { %p3528_p4 = pnand %p3527_p3, %p3521_p0 }
 0xd62   :  { %3418 = vmatpush3.bf16.msra.mxu1 %v3415_v11 }
 0xd63   :  { %3194 = vmatprep.subr.mxu1 %v3544_v12 }
 0xe2f   :  { %v3163_v27 = vpop.f32.mrb[20].mxu1 }
 0xe30   :  { %v1451_v28 = vadd.f32 %v3163_v27, %v2832_v26  ;;  %v1445_v29 = vpop.f32.mrb[21].mxu1 }
 0xe31   :  { %v1446_v30 = vadd.f32 %v2832_v26, %v1445_v29  ;;  %v2847_v29 = vld [vmem:[%s4391_s7 + $0x1] ss:$0 sm:$0xff] }
 0xe32   :  { %v1457_v31 = vmul.f32 0.044715, %v1451_v28  ;;  %v1455_v50 = vmul.f32 0.5, %v1451_v28 }
 0xe33   :  { %v1456_v32 = vmul.f32 0.044715, %v1446_v30  ;;  %v1454_v48 = vmul.f32 0.5, %v1446_v30 }
 0xe34   :  { %v1459_v33 = vmul.f32 %v1457_v31, %v1451_v28 }
 0xe35   :  { %v1458_v34 = vmul.f32 %v1456_v32, %v1446_v30 }
 0xe36   :  { %v1461_v35 = vmul.f32 %v1459_v33, %v1451_v28 }
 0xe37   :  { %v1460_v36 = vmul.f32 %v1458_v34, %v1446_v30 }
 0xe38   :  { %v1463_v37 = vadd.f32 %v1461_v35, %v1451_v28 }
 0xe39   :  { %v1462_v38 = vadd.f32 %v1460_v36, %v1446_v30 }
 0xe3a   :  { %v1465_v39 = vmul.f32 0.7978846, %v1463_v37 }
 0xe3b   :  { %v1464_v41 = vmul.f32 0.7978846, %v1462_v38 }
 0xe3c   :  { %3484 = vtanh.f32 %v1465_v39 }
 0xe3d   :  { %3486 = vtanh.f32 %v1464_v41 }
 0xe46   :  { %v3485_v45 = vpop.eup %3484 }
 0xe47   :  { %v3487_v46 = vpop.eup %3486  ;;  %v1469_v47 = vadd.f32 1.0, %v3485_v45 }
 0xe48   :  { %v1468_v49 = vadd.f32 1.0, %v3487_v46 }
 0xe49   :  { %v1471_v42 = vmul.f32 %v1469_v47, %v1455_v50 }
 0xe4a   :  { %v1470_v51 = vmul.f32 %v1468_v49, %v1454_v48 }
 0xe4c   :  { %3180 = vmatprep.mubr.msk.f32.mxu0 %vm1487_vm12, %v1470_v51 }
 0xe4d   :  { %3181 = vmatmul.mubr.msk.f32.vlgmr.msra.gmra.mrb[6].mxu0 %vm1487_vm12, %v1471_v42 }
 0xe4e   :  { %3206 = vmatprep.mubr.msk.f32.mxu0 %vm3545_vm4, %v3544_v12 }
 0xf20   :  { %v3182_v40 = vpop.f32.mrb[6].mxu0 }
 0xf21   :  { %v1566_v53 = vadd.f32 %v3182_v40, %v2835_v52  ;;  %v1560_v54 = vpop.f32.mrb[7].mxu0 }
 0xf22   :  { %v1561_v55 = vadd.f32 %v2835_v52, %v1560_v54 }
 0xf23   :  { %v1570_v56 = vadd.f32 %v1566_v53, %v4087_v43 }
 0xf24   :  { %v1569_v57 = vadd.f32 %v1561_v55, %v4090_v44 }
 0xf25   :  { %1572 = vst.msk [vmem:[#allocation2 + $0x8] sm:$0xf] %vm386_vm1, %v1570_v56 }
 0xf26   :  { %1571 = vst.msk [vmem:[#allocation2] sm:$0xff] %vm398_vm3, %v1569_v57 }
 0xf2c   :  { %v4159_v58 = vld [vmem:[#allocation2 + $0x8] sm:$0xf] }
 0xf2d   :  { %v1582_v59 = vsel %vm386_vm1, %v4159_v58, 0.0  ;;  %v4163_v60 = vld [vmem:[#allocation2] sm:$0xff] }
 0xf2e   :  { %1583 = vadd.xlane.f32.xlu1 %v1582_v59  ;;  %v1579_v61 = vsel %vm398_vm3, %v4163_v60, 0.0 }
 0xf2f   :  { %1580 = vadd.xlane.f32.xlu0 %v1579_v61 }
 0xfbb   :  { %v1584_v62 = vpop.xlane.xlu1 %1583 }
 0xfbc   :  { %v1586_v43 = vmul.f32 0.03125, %v1584_v62  ;;  %v1581_v63 = vpop.xlane.xlu0 %1580 }
 0xfbd   :  { %v1585_v44 = vmul.f32 0.03125, %v1581_v63 }
 0xfbe   :  { %v1588_v0 = vsub.f32 %v4159_v58, %v1586_v43 }
 0xfbf   :  { %v1587_v1 = vsub.f32 %v4163_v60, %v1585_v44 }
 0xfc0   :  { %v1590_v2 = vmul.f32 %v1588_v0, %v1588_v0 }
 0xfc1   :  { %v1589_v3 = vmul.f32 %v1587_v1, %v1587_v1 }
 0xfc2   :  { %v1594_v4 = vsel %vm386_vm1, %v1590_v2, 0.0 }
 0xfc3   :  { %1595 = vadd.xlane.f32.xlu1 %v1594_v4  ;;  %v1591_v5 = vsel %vm398_vm3, %v1589_v3, 0.0 }
 0xfc4   :  { %1592 = vadd.xlane.f32.xlu0 %v1591_v5 }
0x1050   :  { %v1596_v13 = vpop.xlane.xlu1 %1595 }
0x1051   :  { %v1598_v14 = vmul.f32 0.03125, %v1596_v13  ;;  %v1593_v15 = vpop.xlane.xlu0 %1592 }
0x1052   :  { %v1597_v16 = vmul.f32 0.03125, %v1593_v15 }
0x1053   :  { %v1600_v17 = vadd.f32 1e-12, %v1598_v14 }
0x1054   :  { %v1599_v18 = vadd.f32 1e-12, %v1597_v16 }
0x1055   :  { %3488 = vrsqrt.f32 %v1600_v17 }
0x1056   :  { %3490 = vrsqrt.f32 %v1599_v18 }
0x105f   :  { %v3489_v19 = vpop.eup %3488 }
0x1060   :  { %v3491_v21 = vpop.eup %3490  ;;  %v1604_v22 = vmul.f32 %v3489_v19, %v1588_v0 }
0x1061   :  { %v1603_v23 = vmul.f32 %v3491_v21, %v1587_v1 }
0x1062   :  { %v1612_v25 = vmul.f32 %v2840_v20, %v1604_v22 }
0x1063   :  { %v1611_v26 = vmul.f32 %v2840_v20, %v1603_v23 }
0x1064   :  { %v1620_v28 = vadd.f32 %v2841_v24, %v1612_v25 }
0x1065   :  { %v1619_v27 = vadd.f32 %v2841_v24, %v1611_v26 }
0x1067   :  { %3191 = vmatprep.mubr.msk.f32.mxu1 %vm398_vm3, %v1619_v27 }
0x1068   :  { %3192 = vmatmul.mubr.msk.f32.vlgmr.msra.gmra.mrb[22].mxu1 %vm398_vm3, %v1620_v28 }
0x1069   :  { %3196 = vmatprep.mubr.msk.f32.mxu1 %vm3545_vm4, %v3544_v12 }
0x113b   :  { %v3193_v30 = vpop.f32.mrb[22].mxu1 }
0x113c   :  { %v1712_v31 = vadd.f32 %v3193_v30, %v2847_v29  ;;  %v1706_v32 = vpop.f32.mrb[23].mxu1 }
0x113d   :  { %v4197_v33 = vadd.f32 %v2847_v29, %v1706_v32 }
0x113e   :  { %v2056_v34 = vrot.slane %v1712_v31, 6 }
0x113f   :  { %1884 = vrot.lane.b32.xlu1 %v4197_v33, %s3547_s29  ;;  %1716 = vrot.lane.b32.xlu0 %v4197_v33, %s3546_s1  ;;  %v2055_v35 = vrot.slane %v4197_v33, 6 }
0x1141   :  { %v4205_v36 = vsel %vm880_vm8, %v2055_v35, %v2056_v34 }
0x1143   :  { %1882 = vrot.lane.b32.xlu1 %v4197_v33, %s3549_s23  ;;  %2226 = vrot.lane.b32.xlu0 %v4205_v36, %s3547_s29 }
0x1147   :  { %2058 = vrot.lane.b32.xlu1 %v4205_v36, %s3546_s1 }
0x114b   :  { %2224 = vrot.lane.b32.xlu1 %v4205_v36, %s3549_s23 }
0x11b1   :  { %v1885_v37 = vpop.permute.xlu1 %1884  ;;  %v1717_v38 = vpop.permute.xlu0 %1716 }
0x11b2   :  { %3195 = vmatpush3.xpose.msk.msra.mxu1 %vm537_vm5, %v1717_v38  ;;  %3205 = vmatpush3.xpose.msk.msra.mxu0 %vm537_vm5, %v1885_v37 }
0x11b3   :  { %3214 = vmatprep.subr.mxu0 %v3544_v12  ;;  %3199 = vmatprep.subr.mxu1 %v3544_v12 }
0x11b5   :  { %v1883_v39 = vpop.permute.xlu1 %1882  ;;  %3197 = vmatmul.mubr.msk.f32.vlgmr.msra.gmra.mrb[24].mxu1 %vm537_vm5, %v4197_v33  ;;  %v2227_v45 = vpop.permute.xlu0 %2226 }
0x11b6   :  { %3207 = vmatmul.mubr.msk.f32.vlgmr.msra.gmra.mrb[8].mxu0 %vm537_vm5, %v1883_v39  ;;  %3201 = vmatprep.mubr.msk.f32.mxu1 %vm3545_vm4, %v3544_v12  ;;  %v2866_v39 = vld [vmem:[%s4392_s8 + $0x20] sm:$0xff] }
0x11b7   :  { %3216 = vmatprep.mubr.msk.f32.mxu0 %vm3545_vm4, %v3544_v12 }
0x11b9   :  { %v2059_v41 = vpop.permute.xlu1 %2058 }
0x11ba   :  { %3215 = vmatpush3.xpose.msk.msra.mxu0 %vm537_vm5, %v2059_v41  ;;  %v2867_v41 = vld [vmem:[%s4392_s8 + $0x28] sm:$0xff] }
0x11bb   :  { %3224 = vmatprep.subr.mxu0 %v3544_v12 }
0x11bd   :  { %3217 = vmatmul.mubr.msk.f32.vlgmr.msra.gmra.mrb[10].mxu0 %vm537_vm5, %v4205_v36  ;;  %v2225_v46 = vpop.permute.xlu1 %2224 }
0x11be   :  { %3225 = vmatpush3.xpose.msk.msra.mxu0 %vm537_vm5, %v2227_v45  ;;  %3226 = vmatprep.mubr.msk.f32.mxu0 %vm3545_vm4, %v3544_v12  ;;  %v3419_v45 = vpack.c.bf16 %v2867_v41, %v2866_v39  ;;  %v2883_v41 = vld [vmem:[%s4397_s13 + $0x1] ss:$0 sm:$0xff] }
0x11c0   :  { %3420 = vmatprep.subr.bf16.mxu0 %v3419_v45 }
0x11c1   :  { %3227 = vmatmul.mubr.msk.f32.vlgmr.msra.gmra.mrb[12].mxu0 %vm537_vm5, %v2225_v46  ;;  %v2868_v46 = vld [vmem:[%s4392_s8 + $0x30] sm:$0xff] }
0x11c2   :  { %3422 = vmatpush3.bf16.msra.mxu0 %v3419_v45 }
0x1288   :  { %v1788_v47 = vpop.f32.mrb[24].mxu1 }
0x1289   :  { %v1792_v48 = vmul.f32 0.25, %v1788_v47  ;;  %v3198_v49 = vpop.f32.mrb[25].mxu1  ;;  %v1956_v50 = vpop.f32.mrb[8].mxu0  ;;  %v2869_v47 = vld [vmem:[%s4392_s8 + $0x38] sm:$0xff] }
0x128a   :  { %v1960_v51 = vmul.f32 0.25, %v1956_v50  ;;  %v3208_v42 = vpop.f32.mrb[9].mxu0 }
0x128b   :  { %v1793_v52 = vsel %vm613_vm6, %v1792_v48, -inf }
0x128c   :  { %1794 = vmax.xlane.f32.xlu0 %v1793_v52  ;;  %v1961_v40 = vsel %vm613_vm6, %v1960_v51, -inf }
0x128d   :  { %1962 = vmax.xlane.f32.xlu1 %v1961_v40 }
0x1290   :  { %v2130_v53 = vpop.f32.mrb[10].mxu0 }
0x1291   :  { %v2134_v54 = vmul.f32 0.25, %v2130_v53  ;;  %v3218_v55 = vpop.f32.mrb[11].mxu0  ;;  %v2871_v53 = vld [vmem:[%s4393_s9 + $0x1] ss:$0 sm:$0xff] }
0x1293   :  { %v2135_v56 = vsel %vm613_vm6, %v2134_v54, -inf }
0x1294   :  { %2136 = vmax.xlane.f32.xlu0 %v2135_v56  ;;  %v2298_v57 = vpop.f32.mrb[12].mxu0 }
0x1295   :  { %v2302_v59 = vmul.f32 0.25, %v2298_v57  ;;  %v3228_v61 = vpop.f32.mrb[13].mxu0 }
0x1297   :  { %v2303_v62 = vsel %vm613_vm6, %v2302_v59, -inf }
0x1298   :  { %2304 = vmax.xlane.f32.xlu0 %v2303_v62 }
0x1319   :  { %v1795_v43 = vpop.xlane.xlu0 %1794 }
0x131a   :  { %v1796_v63 = vsub.f32 %v1792_v48, %v1795_v43  ;;  %v1963_v44 = vpop.xlane.xlu1 %1962  ;;  %v3423_v48 = vpack.c.bf16 %v2869_v47, %v2868_v46 }
0x131b   :  { %v1964_v0 = vsub.f32 %v1960_v51, %v1963_v44 }
0x131c   :  { %v1797_v1 = vmul.f32 1.442695, %v1796_v63  ;;  %3424 = vmatprep.subr.bf16.mxu0 %v3423_v48 }
0x131d   :  { %v1965_v2 = vmul.f32 1.442695, %v1964_v0  ;;  %3426 = vmatpush3.bf16.msra.mxu0 %v3423_v48 }
0x131e   :  { %3492 = vpow2.f32 %v1797_v1 }
0x131f   :  { %3494 = vpow2.f32 %v1965_v2 }
0x1321   :  { %v2137_v3 = vpop.xlane.xlu0 %2136 }
0x1322   :  { %v2138_v4 = vsub.f32 %v2134_v54, %v2137_v3 }
0x1324   :  { %v2139_v5 = vmul.f32 1.442695, %v2138_v4 }
0x1325   :  { %v2305_v13 = vpop.xlane.xlu0 %2304 }
0x1326   :  { %3496 = vpow2.f32 %v2139_v5  ;;  %v2306_v14 = vsub.f32 %v2302_v59, %v2305_v13 }
0x1328   :  { %v3493_v6 = vpop.eup %3492  ;;  %v2307_v15 = vmul.f32 1.442695, %v2306_v14 }
0x1329   :  { %v3495_v7 = vpop.eup %3494  ;;  %v1799_v8 = vsel %vm613_vm6, %v3493_v6, 0.0 }
0x132a   :  { %1800 = vadd.xlane.f32.xlu0 %v1799_v8  ;;  %v1967_v9 = vsel %vm613_vm6, %v3495_v7, 0.0  ;;  %3498 = vpow2.f32 %v2307_v15 }
0x132b   :  { %1968 = vadd.xlane.f32.xlu1 %v1967_v9  ;;  %v2880_v9 = vld [vmem:[%s4396_s12 + $0x30] sm:$0xff] }
0x1330   :  { %v3497_v10 = vpop.eup %3496 }
0x1331   :  { %v2141_v11 = vsel %vm613_vm6, %v3497_v10, 0.0 }
0x1332   :  { %2142 = vadd.xlane.f32.xlu0 %v2141_v11 }
0x1334   :  { %v3499_v16 = vpop.eup %3498 }
0x1335   :  { %v2309_v17 = vsel %vm613_vm6, %v3499_v16, 0.0 }
0x133c   :  { %1972 = vrot.lane.b32.xlu1 %v4197_v33, %s3550_s20 }
0x1340   :  { %2146 = vrot.lane.b32.xlu1 %v4205_v36, %s3548_s3 }
0x1348   :  { %1804 = vrot.lane.b32.xlu0 %v4197_v33, %s3548_s3 }
0x1364   :  { %2310 = vadd.xlane.f32.xlu1 %v2309_v17 }
0x1375   :  { %2314 = vrot.lane.b32.xlu1 %v4205_v36, %s3550_s20 }
0x13b7   :  { %v1801_v18 = vpop.xlane.xlu0 %1800 }
0x13b8   :  { %3500 = vrcp.f32 %v1801_v18  ;;  %v1969_v19 = vpop.xlane.xlu1 %1968 }
0x13b9   :  { %3502 = vrcp.f32 %v1969_v19 }
0x13bc   :  { %v1973_v23 = vpop.permute.xlu1 %1972 }
0x13bf   :  { %v2143_v20 = vpop.xlane.xlu0 %2142 }
0x13c0   :  { %3504 = vrcp.f32 %v2143_v20  ;;  %v2147_v27 = vpop.permute.xlu1 %2146  ;;  %v2876_v20 = vld [vmem:[%s4394_s10 + $0x1] ss:$0 sm:$0xff] }
0x13c2   :  { %v3501_v21 = vpop.eup %3500 }
0x13c3   :  { %v1803_v22 = vmul.f32 %v3501_v21, %v3493_v6  ;;  %v1805_v24 = vpop.permute.xlu0 %1804  ;;  %v3503_v25 = vpop.eup %3502  ;;  %v2878_v6 = vld [vmem:[%s4396_s12 + $0x20] sm:$0xff] }
0x13c4   :  { %3200 = vmatpush3.msk.msra.mxu1 %vm631_vm7, %v1805_v24  ;;  %v1971_v26 = vmul.f32 %v3503_v25, %v3495_v7  ;;  %v2879_v7 = vld [vmem:[%s4396_s12 + $0x28] sm:$0xff] }
0x13c5   :  { %3202 = vmatmul.mubr.msk.f32.vlgmr.msra.gmra.mrb[26].mxu1 %vm627_vm9, %v1803_v22  ;;  %3209 = vmatprep.subr.mxu1 %v3544_v12  ;;  %v3427_v8 = vpack.c.bf16 %v2879_v7, %v2878_v6  ;;  %v2877_v22 = vld [vmem:[%s4395_s11 + $0x1] ss:$0 sm:$0xff] }
0x13c6   :  { %3210 = vmatpush3.msk.msra.mxu1 %vm631_vm7, %v1973_v23  ;;  %3211 = vmatprep.mubr.msk.f32.mxu1 %vm3545_vm4, %v3544_v12 }
0x13c7   :  { %3219 = vmatprep.subr.mxu1 %v3544_v12 }
0x13c9   :  { %3212 = vmatmul.mubr.msk.f32.vlgmr.msra.gmra.mrb[28].mxu1 %vm627_vm9, %v1971_v26 }
0x13ca   :  { %v3505_v28 = vpop.eup %3504  ;;  %3220 = vmatpush3.msk.msra.mxu1 %vm631_vm7, %v2147_v27  ;;  %3221 = vmatprep.mubr.msk.f32.mxu1 %vm3545_vm4, %v3544_v12 }
0x13cb   :  { %v2145_v29 = vmul.f32 %v3505_v28, %v3497_v10  ;;  %3229 = vmatprep.subr.mxu1 %v3544_v12  ;;  %v2881_v10 = vld [vmem:[%s4396_s12 + $0x38] sm:$0xff] }
0x13cc   :  { %v3431_v11 = vpack.c.bf16 %v2881_v10, %v2880_v9 }
0x13cd   :  { %3222 = vmatmul.mubr.msk.f32.vlgmr.msra.gmra.mrb[30].mxu1 %vm627_vm9, %v2145_v29  ;;  %v2886_v29 = vld [vmem:[%s4398_s14 + $0x40] sm:$0xff] }
0x13ce   :  { %3231 = vmatprep.mubr.msk.f32.mxu1 %vm3545_vm4, %v3544_v12 }
0x13f1   :  { %v2311_v30 = vpop.xlane.xlu1 %2310 }
0x13f2   :  { %3506 = vrcp.f32 %v2311_v30  ;;  %v2887_v30 = vld [vmem:[%s4398_s14 + $0x48] sm:$0xff] }
0x13f5   :  { %v2315_v31 = vpop.permute.xlu1 %2314 }
0x13f6   :  { %3230 = vmatpush3.msk.msra.mxu1 %vm631_vm7, %v2315_v31  ;;  %v3435_v31 = vpack.c.bf16 %v2887_v30, %v2886_v29 }
0x13f7   :  { %3428 = vmatprep.subr.bf16.mxu1 %v3427_v8 }
0x13f8   :  { %3436 = vmatprep.subr.bf16.mxu0 %v3435_v31 }
0x13fc   :  { %v3507_v32 = vpop.eup %3506 }
0x13fd   :  { %v2313_v33 = vmul.f32 %v3507_v32, %v3499_v16  ;;  %v2888_v32 = vld [vmem:[%s4398_s14 + $0x50] sm:$0xff] }
0x13ff   :  { %3232 = vmatmul.mubr.msk.f32.vlgmr.msra.gmra.mrb[32].mxu1 %vm627_vm9, %v2313_v33  ;;  %v2889_v33 = vld [vmem:[%s4398_s14 + $0x58] sm:$0xff] }
0x1400   :  { %3430 = vmatpush3.bf16.msra.mxu1 %v3427_v8 }
0x1401   :  { %3432 = vmatprep.subr.bf16.mxu1 %v3431_v11 }
0x1404   :  { %3434 = vmatpush3.bf16.msra.mxu1 %v3431_v11 }
0x1498   :  { %v1877_v34 = vpop.f32.mrb[26].mxu1 }
0x1499   :  { %1881 = vst.msk [vmem:[#allocation3] sm:$0x3f] %vm704_vm10, %v1877_v34  ;;  %v3203_v35 = vpop.f32.mrb[27].mxu1  ;;  %v3439_v34 = vpack.c.bf16 %v2889_v33, %v2888_v32 }
0x149a   :  { %v2890_v35 = vld [vmem:[%s4398_s14 + $0x60] sm:$0xff] }
0x149c   :  { %v2045_v36 = vpop.f32.mrb[28].mxu1 }
0x149d   :  { %2050 = vrot.lane.b32.xlu0 %v2045_v36, %s3551_s21  ;;  %v3213_v37 = vpop.f32.mrb[29].mxu1  ;;  %v2891_v36 = vld [vmem:[%s4398_s14 + $0x68] sm:$0xff] }
0x149e   :  { %v3443_v37 = vpack.c.bf16 %v2891_v36, %v2890_v35 }
0x14a0   :  { %v2219_v38 = vpop.f32.mrb[30].mxu1 }
0x14a1   :  { %2223 = vst.msk [vmem:[#allocation3 + $0x6] sm:$0x3f] %vm704_vm10, %v2219_v38  ;;  %v3223_v12 = vpop.f32.mrb[31].mxu1  ;;  %v2892_v38 = vld [vmem:[%s4398_s14 + $0x70] sm:$0xff] }
0x14a2   :  { %v2893_v12 = vld [vmem:[%s4398_s14 + $0x78] sm:$0xff] }
0x14a3   :  { %v3447_v39 = vpack.c.bf16 %v2893_v12, %v2892_v38 }
0x14d2   :  { %v2387_v49 = vpop.f32.mrb[32].mxu1 }
0x14d3   :  { %2392 = vrot.lane.b32.xlu1 %v2387_v49, %s3551_s21  ;;  %v3233_v50 = vpop.f32.mrb[33].mxu1 }
0x150f   :  { %v2051_v51 = vpop.permute.xlu0 %2050 }
0x1510   :  { %2053 = vst.msk [vmem:[#allocation3] sm:$0x3f] %vm877_vm11, %v2051_v51 }
0x1545   :  { %v2393_v42 = vpop.permute.xlu1 %2392 }
0x1546   :  { %2395 = vst.msk [vmem:[#allocation3 + $0x6] sm:$0x3f] %vm877_vm11, %v2393_v42 }
0x154d   :  { %v2396_v52 = vld [vmem:[#allocation3] sm:$0xff]  ;;  %v2397_v40 = vld [vmem:[#allocation3 + $0x8] sm:$0xf] }
0x154e   :  { %3242 = vmatprep.mubr.msk.f32.mxu0 %vm398_vm3, %v2396_v52 }
0x154f   :  { %3243 = vmatmul.mubr.msk.f32.vlgmr.msra.gmra.mrb[14].mxu0 %vm398_vm3, %v2397_v40 }
0x1550   :  { %3438 = vmatpush3.bf16.msra.mxu0 %v3435_v31  ;;  %v2755_v31 = vld [vmem:[%s4401_s17] sm:$0x1] }
0x1551   :  { %3440 = vmatprep.subr.bf16.mxu0 %v3439_v34 }
0x1554   :  { %3442 = vmatpush3.bf16.msra.mxu0 %v3439_v34 }
0x1555   :  { %3444 = vmatprep.subr.bf16.mxu0 %v3443_v37 }
0x1558   :  { %3446 = vmatpush3.bf16.msra.mxu0 %v3443_v37 }
0x1559   :  { %3448 = vmatprep.subr.bf16.mxu0 %v3447_v39 }
0x155c   :  { %3450 = vmatpush3.bf16.msra.mxu0 %v3447_v39 }
0x1622   :  { %v3244_v54 = vpop.f32.mrb[14].mxu0 }
0x1623   :  { %v2489_v55 = vadd.f32 %v3244_v54, %v2871_v53  ;;  %v2483_v56 = vpop.f32.mrb[15].mxu0 }
0x1624   :  { %v2484_v57 = vadd.f32 %v2871_v53, %v2483_v56 }
0x1625   :  { %v4291_v59 = vadd.f32 %v2489_v55, %v4159_v58 }
0x1626   :  { %v4294_v61 = vadd.f32 %v2484_v57, %v4163_v60 }
0x1627   :  { %v2501_v62 = vsel %vm386_vm1, %v4291_v59, 0.0 }
0x1628   :  { %2502 = vadd.xlane.f32.xlu1 %v2501_v62  ;;  %v2498_v43 = vsel %vm398_vm3, %v4294_v61, 0.0 }
0x1629   :  { %2499 = vadd.xlane.f32.xlu0 %v2498_v43 }
0x16b5   :  { %v2503_v63 = vpop.xlane.xlu1 %2502 }
0x16b6   :  { %v2505_v44 = vmul.f32 0.03125, %v2503_v63  ;;  %v2500_v0 = vpop.xlane.xlu0 %2499 }
0x16b7   :  { %v2504_v1 = vmul.f32 0.03125, %v2500_v0 }
0x16b8   :  { %v2507_v2 = vsub.f32 %v4291_v59, %v2505_v44 }
0x16b9   :  { %v2506_v58 = vsub.f32 %v4294_v61, %v2504_v1 }
0x16ba   :  { %v2509_v4 = vmul.f32 %v2507_v2, %v2507_v2 }
0x16bb   :  { %v2508_v3 = vmul.f32 %v2506_v58, %v2506_v58 }
0x16bc   :  { %v2513_v5 = vsel %vm386_vm1, %v2509_v4, 0.0 }
0x16bd   :  { %v2510_v60 = vsel %vm398_vm3, %v2508_v3, 0.0 }
0x16be   :  { %2511 = vadd.xlane.f32.xlu0 %v2510_v60 }
0x16c2   :  { %2514 = vadd.xlane.f32.xlu0 %v2513_v5 }
0x174b   :  { %v2512_v13 = vpop.xlane.xlu0 %2511 }
0x174c   :  { %v2516_v14 = vmul.f32 0.03125, %v2512_v13 }
0x174e   :  { %v2518_v15 = vadd.f32 1e-12, %v2516_v14 }
0x174f   :  { %v2515_v16 = vpop.xlane.xlu0 %2514 }
0x1750   :  { %3508 = vrsqrt.f32 %v2518_v15  ;;  %v2517_v17 = vmul.f32 0.03125, %v2515_v16 }
0x1752   :  { %v2519_v18 = vadd.f32 1e-12, %v2517_v17 }
0x1754   :  { %3510 = vrsqrt.f32 %v2519_v18 }
0x175a   :  { %v3509_v19 = vpop.eup %3508 }
0x175b   :  { %v2522_v21 = vmul.f32 %v3509_v19, %v2506_v58  ;;  %v2895_v58 = vld [vmem:[%s4399_s15 + $0x1] ss:$0 sm:$0xff] }
0x175d   :  { %v2530_v23 = vmul.f32 %v2876_v20, %v2522_v21 }
0x175e   :  { %v3511_v24 = vpop.eup %3510 }
0x175f   :  { %v2523_v25 = vmul.f32 %v3511_v24, %v2507_v2  ;;  %v2538_v26 = vadd.f32 %v2877_v22, %v2530_v23 }
0x1761   :  { %v2531_v27 = vmul.f32 %v2876_v20, %v2523_v25  ;;  %3253 = vmatprep.mubr.msk.f32.mxu1 %vm398_vm3, %v2538_v26 }
0x1763   :  { %v2539_v28 = vadd.f32 %v2877_v22, %v2531_v27 }
0x1765   :  { %3254 = vmatmul.mubr.msk.f32.vlgmr.msra.gmra.mrb[34].mxu1 %vm398_vm3, %v2539_v28  ;;  %v2754_v28 = vld [vmem:[%s4400_s16] sm:$0x1] }
0x1838   :  { %v3255_v45 = vpop.f32.mrb[34].mxu1 }
0x1839   :  { %v2631_v46 = vadd.f32 %v3255_v45, %v2883_v41  ;;  %v2625_v47 = vpop.f32.mrb[35].mxu1 }
0x183a   :  { %v2626_v48 = vadd.f32 %v2883_v41, %v2625_v47 }
0x183b   :  { %v2637_v49 = vmul.f32 0.044715, %v2631_v46  ;;  %v2635_v0 = vmul.f32 0.5, %v2631_v46 }
0x183c   :  { %v2636_v50 = vmul.f32 0.044715, %v2626_v48  ;;  %v2634_v63 = vmul.f32 0.5, %v2626_v48 }
0x183d   :  { %v2639_v51 = vmul.f32 %v2637_v49, %v2631_v46 }
0x183e   :  { %v2638_v42 = vmul.f32 %v2636_v50, %v2626_v48 }
0x183f   :  { %v2641_v52 = vmul.f32 %v2639_v51, %v2631_v46 }
0x1840   :  { %v2640_v40 = vmul.f32 %v2638_v42, %v2626_v48 }
0x1841   :  { %v2643_v53 = vadd.f32 %v2641_v52, %v2631_v46 }
0x1842   :  { %v2642_v54 = vadd.f32 %v2640_v40, %v2626_v48 }
0x1843   :  { %v2645_v55 = vmul.f32 0.7978846, %v2643_v53 }
0x1844   :  { %v2644_v56 = vmul.f32 0.7978846, %v2642_v54 }
0x1845   :  { %3512 = vtanh.f32 %v2645_v55 }
0x1846   :  { %3514 = vtanh.f32 %v2644_v56 }
0x184f   :  { %v3513_v57 = vpop.eup %3512 }
0x1850   :  { %v3515_v62 = vpop.eup %3514  ;;  %v2649_v43 = vadd.f32 1.0, %v3513_v57 }
0x1851   :  { %v2648_v44 = vadd.f32 1.0, %v3515_v62 }
0x1852   :  { %v2651_v2 = vmul.f32 %v2649_v43, %v2635_v0 }
0x1853   :  { %v2650_v1 = vmul.f32 %v2648_v44, %v2634_v63 }
0x1855   :  { %3272 = vmatprep.mubr.msk.f32.mxu0 %vm1487_vm12, %v2650_v1 }
0x1856   :  { %3273 = vmatmul.mubr.msk.f32.vlgmr.msra.gmra.mrb[16].mxu0 %vm1487_vm12, %v2651_v2 }
0x1929   :  { %v3274_v3 = vpop.f32.mrb[16].mxu0 }
0x192a   :  { %v2747_v60 = vadd.f32 %v3274_v3, %v2895_v58  ;;  %v2741_v4 = vpop.f32.mrb[17].mxu0 }
0x192b   :  { %v2742_v5 = vadd.f32 %v2895_v58, %v2741_v4 }
0x192c   :  { %v2751_v6 = vadd.f32 %v2747_v60, %v4291_v59 }
0x192d   :  { %v2750_v7 = vadd.f32 %v2742_v5, %v4294_v61 }
0x192e   :  { %2753 = vst.msk [vmem:[#allocation2 + $0x8] sm:$0xf] %vm386_vm1, %v2751_v6 }
0x192f   :  { %2752 = vst.msk [vmem:[#allocation2] sm:$0xff] %vm398_vm3, %v2750_v7 }
0x1936   :  { %v2774_v8 = vld [vmem:[#allocation2 + $0x6] sm:$0x1]  ;;  %v2756_v9 = vld [vmem:[#allocation2] sm:$0x1] }
0x1937   :  { %v2775_v10 = vsel %vm2757_vm13, %v2774_v8, 0.0  ;;  %v2758_v11 = vsel %vm2757_vm13, %v2756_v9, 0.0 }
0x1938   :  { %2776 = vadd.xlane.f32.xlu1 %v2775_v10  ;;  %2759 = vadd.xlane.f32.xlu0 %v2758_v11 }
0x19c5   :  { %v2777_v13 = vpop.xlane.xlu1 %2776  ;;  %v2760_v14 = vpop.xlane.xlu0 %2759 }
0x19c6   :  { %v2778_v15 = vmul.f32 0.03125, %v2777_v13  ;;  %v2761_v16 = vmul.f32 0.03125, %v2760_v14 }
0x19c8   :  { %v2779_v59 = vsub.f32 %v2774_v8, %v2778_v15  ;;  %v2762_v17 = vsub.f32 %v2756_v9, %v2761_v16 }
0x19ca   :  { %v2780_v61 = vmul.f32 %v2779_v59, %v2779_v59  ;;  %v2763_v18 = vmul.f32 %v2762_v17, %v2762_v17 }
0x19cc   :  { %v2781_v19 = vsel %vm2757_vm13, %v2780_v61, 0.0  ;;  %v2764_v20 = vsel %vm2757_vm13, %v2763_v18, 0.0 }
0x19cd   :  { %2782 = vadd.xlane.f32.xlu1 %v2781_v19  ;;  %2765 = vadd.xlane.f32.xlu0 %v2764_v20 }
0x1a5a   :  { %v2783_v21 = vpop.xlane.xlu1 %2782  ;;  %v2766_v22 = vpop.xlane.xlu0 %2765 }
0x1a5b   :  { %v2784_v23 = vmul.f32 0.03125, %v2783_v21  ;;  %v2767_v24 = vmul.f32 0.03125, %v2766_v22 }
0x1a5d   :  { %v2785_v25 = vadd.f32 1e-12, %v2784_v23  ;;  %v2768_v26 = vadd.f32 1e-12, %v2767_v24 }
0x1a5f   :  { %3516 = vrsqrt.f32 %v2785_v25 }
0x1a60   :  { %3518 = vrsqrt.f32 %v2768_v26 }
0x1a69   :  { %v3517_v27 = vpop.eup %3516 }
0x1a6a   :  { %v3519_v29 = vpop.eup %3518  ;;  %v2787_v30 = vmul.f32 %v3517_v27, %v2779_v59 }
0x1a6b   :  { %v2770_v32 = vmul.f32 %v3519_v29, %v2762_v17 }
0x1a6c   :  { %v2788_v33 = vmul.f32 %v2787_v30, %v2754_v28 }
0x1a6d   :  { %v2771_v34 = vmul.f32 %v2770_v32, %v2754_v28 }
0x1a6e   :  { %v2789_v35 = vadd.f32 %v2788_v33, %v2755_v31 }
0x1a6f   :  { %v2772_v36 = vadd.f32 %v2771_v34, %v2755_v31 }
0x1a70   :  { %2790 = vst.msk [vmem:[#allocation4 + $0x1] sm:$0x1] %vm2757_vm13, %v2789_v35 }
0x1a71   :  { %2773 = vst.msk [vmem:[#allocation4] sm:$0x1] %vm2757_vm13, %v2772_v36 }
0x1a72   :  { %3531 = shalt.err (!%p3528_p4)
}
0x1a73   :  { %s3532_s4 = scalar_lea.hbm %s4402_s18, 32 }
0x1a74   :  { %p3533_p5 = scmp.ne.s32.totalorder %s4402_s18, %s3532_s4  ;;  %p3536_p6 = scmp.lt.u32.totalorder %s3532_s4, %s4402_s18 }
0x1a76   :  { %p3538_p7 = pnand %p3536_p6, %p3533_p5 }
0x1a78   :  { %3541 = shalt.err (!%p3538_p7)
}
0x1a79   :  { %2800 = dma.vmem_to_hbm [thread:$0]  %s2798_s24, 32, %s4402_s18, [#allocation5]  }
0x1a7a   :  { %3542 = dma.done.wait [#allocation5], 32  }
0x1a7b   :  { %3543 = vsyncadd [#allocation5], 4294967264 }
0x1a7c   :  { %2804 = vsyncpa [#allocation5], 1 }

</bundles_post_ra>
